<compile_context>
chip_gen: v7x
topology: tpu7x:2x2x1
jax: 0.10.0
libtpu: 0.0.40
codegen_flags: <defaults>
</compile_context>

<pallas_src>
import functools

import numpy as np
import jax
import jax.numpy as jnp
from jax.experimental import pallas as pl
from jax.experimental.pallas import tpu as pltpu

VOCAB = 30000          # English bert-base-cased vocab size used by the module
H = 32                 # lstm_hidden
NUM_RAW = 10           # numerical_input features (14 total - 4 one-hot embeddings)
FEAT = NUM_RAW + 13 + 2 + 10 + 3   # 38: folded listings_mlp input width
NP = 8                 # review batch rows, padded to a full sublane tile

_VMEM = pl.BlockSpec(memory_space=pltpu.MemorySpace.VMEM)


# --------------------------------------------------------------------------
# LSTM cell on a gate tile with 4 blocks of width G in (i, f, g, o) order.
# sigmoid runs on the full tile (fewer ops); tanh only on the g block since
# EUP latency is on the serial recurrence chain.
# --------------------------------------------------------------------------
def _cell(gates, c_prev, G):
    sg = jax.nn.sigmoid(gates)
    i = sg[:, 0 * G:1 * G]
    f = sg[:, 1 * G:2 * G]
    o = sg[:, 3 * G:4 * G]
    g = jnp.tanh(gates[:, 2 * G:3 * G])
    c = f * c_prev + i * g
    h = o * jnp.tanh(c)
    return h, c


# --------------------------------------------------------------------------
# Fused kernel: 2-layer bidirectional LSTM + tanh(Linear(2H->1)) sentiment +
# per-listing review mean + folded listings MLP + final MLP (whole forward).
# --------------------------------------------------------------------------
def fused_kernel(x_ref, p0_ref, wbd_ref, wih1_ref, b1_ref, whh1f_ref, wob_ref,
                 feat_ref, wpack_ref, out_ref, gx0_ref, h1_ref, *, B, R):
    # x_ref:    [NP, L]     embedded review tokens (rows >= B*R are padding)
    # p0_ref:   [3, 8H]     rows: wf_perm, wb_perm, b_comb (grouped columns)
    # wbd_ref:  [2H, 8H]    block-diagonal layer-0 W_hh (fwd rows 0:H, bwd H:2H)
    # wih1_ref: [4H, 4H]    rows 0:2H fwd W_ih_l1, rows 2H:4H bwd W_ih_l1
    # b1_ref:   [2, 4H]     rows: b_l1_f, b_l1_b
    # whh1f_ref:[H, 4H]     layer-1 forward W_hh (bwd one never needed)
    # wob_ref:  [1, 2H+1]   lstm_output weight (cols 0:2H) and bias (col 2H)
    # feat_ref: [B, 38]     cat([numerical, property, room, bath, host])
    # wpack_ref:[41, 8]     rows 0:38 folded W1, 38 b_eff, 39 W2 row, 40 tail
    # out_ref:  [B, 1]      final relu(final_mlp([listings, sentiment]))
    L = gx0_ref.shape[0]
    Hd = whh1f_ref.shape[0]
    W2 = 2 * Hd
    f32 = jnp.float32

    # ---- layer 0: hoisted input projection (D == 1 -> broadcast multiplies).
    #      Row s of gx0 holds the fwd gates for time s AND the bwd gates for
    #      time L-1-s, already in the grouped 8H column layout.
    x = x_ref[...]                                            # [NP, L]
    wf = p0_ref[0:1, :]
    wb = p0_ref[1:2, :]
    bc = p0_ref[2:3, :]
    for s in range(L):
        gx0_ref[s] = x[:, s:s + 1] * wf + x[:, L - 1 - s:L - s] * wb + bc

    # ---- layer 0: fwd+bwd fused recurrence, fully unrolled (static L).
    #      ONE block-diagonal matmul per step; h/c carried in vregs.
    wbd = wbd_ref[...]                                        # [2H, 8H]
    h_cat = jnp.zeros((NP, W2), f32)                          # [h_f | h_b]
    c_cat = jnp.zeros((NP, W2), f32)
    for s in range(L):
        gates = gx0_ref[s] + jnp.dot(h_cat, wbd, preferred_element_type=f32)
        h_cat, c_cat = _cell(gates, c_cat, W2)
        # layer-1 inputs in original time order; stores are off the critical
        # dependency chain of the next step.
        h1_ref[s * NP:(s + 1) * NP, 0:Hd] = h_cat[:, 0:Hd]
        h1_ref[(L - 1 - s) * NP:(L - s) * NP, Hd:W2] = h_cat[:, Hd:W2]

    # ---- layer 1 forward: ONE batched input projection ([L*8,2H]@[2H,4H]),
    #      then the serial recurrence over aligned 8-row slices.
    h1 = h1_ref[...]                                          # [L*NP, 2H]
    gx1 = (jnp.dot(h1, wih1_ref[0:W2, :], preferred_element_type=f32)
           + b1_ref[0:1, :])                                  # [L*NP, 4H]
    whh1f = whh1f_ref[...]
    h2f = jnp.zeros((NP, Hd), f32)
    c2f = jnp.zeros((NP, Hd), f32)
    for s in range(L):
        gates = gx1[s * NP:(s + 1) * NP, :] + jnp.dot(
            h2f, whh1f, preferred_element_type=f32)
        h2f, c2f = _cell(gates, c2f, Hd)

    # ---- layer 1 backward at t == L-1 only: single step from zero state
    #      (h_prev @ W_hh == 0), which is exactly output[:, -1, H:2H] in
    #      PyTorch bidirectional semantics.  INVARIANT: downstream only ever
    #      reads output[:, -1, :], so earlier layer-1 backward timesteps are
    #      never computed or stored.
    gates_b = (jnp.dot(h1[(L - 1) * NP:L * NP, :], wih1_ref[W2:2 * W2, :],
                       preferred_element_type=f32) + b1_ref[1:2, :])
    h2b, _ = _cell(gates_b, jnp.zeros((NP, Hd), f32), Hd)

    # ---- per-review sentiment head: tanh(Linear(2H -> 1))
    val = (jnp.sum(h2f * wob_ref[:, 0:Hd], axis=-1, keepdims=True)
           + jnp.sum(h2b * wob_ref[:, Hd:W2], axis=-1, keepdims=True)
           + wob_ref[:, W2:W2 + 1])
    sent = jnp.tanh(val)                                      # [NP, 1]

    # ---- listings head epilogue: folded one-hot linears + listings MLP +
    #      per-listing review mean + final MLP, all in-kernel.
    F = feat_ref.shape[1]
    w_eff = wpack_ref[0:F, :]
    b_eff = wpack_ref[F:F + 1, :]
    w2 = wpack_ref[F + 1:F + 2, :]
    tail = wpack_ref[F + 2:F + 3, :]        # [b2, wf_y, wf_sent, bf, 0...]
    y = jnp.maximum(jnp.dot(feat_ref[...], w_eff,
                            preferred_element_type=f32) + b_eff, 0.0)
    y2 = jnp.maximum(jnp.sum(y * w2, axis=-1, keepdims=True)
                     + tail[:, 0:1], 0.0)                     # [B, 1]
    for b in range(B):
        acc = sent[b * R:b * R + 1, :]
        for r in range(1, R):
            acc = acc + sent[b * R + r:b * R + r + 1, :]
        sm = acc * (1.0 / R)                                  # mean over reviews
        z = y2[b:b + 1, :] * tail[:, 1:2] + sm * tail[:, 2:3] + tail[:, 3:4]
        out_ref[b:b + 1, :] = jnp.maximum(z, 0.0)


def fused_forward(x_pad, p0, wbd, wih1, b1, whh1f, wob, feat, wpack, *, reviews):
    B = feat.shape[0]
    L = x_pad.shape[1]
    Hd = whh1f.shape[0]
    kernel = functools.partial(fused_kernel, B=B, R=reviews)
    return pl.pallas_call(
        kernel,
        out_shape=jax.ShapeDtypeStruct((B, 1), jnp.float32),
        in_specs=[_VMEM] * 9,
        out_specs=_VMEM,
        scratch_shapes=[pltpu.VMEM((L, NP, 8 * Hd), jnp.float32),   # gx0 (grouped)
                        pltpu.VMEM((L * NP, 2 * Hd), jnp.float32)],  # h1 [fwd|bwd]
    )(x_pad, p0, wbd, wih1, b1, whh1f, wob, feat, wpack)


# --------------------------------------------------------------------------
# Parameter init (deterministic, PyTorch-style uniform(+-1/sqrt(fan_in)))
# --------------------------------------------------------------------------
def init_params(key):
    keys = iter(jax.random.split(key, 64))

    def u(shape, fan_in):
        bound = 1.0 / float(np.sqrt(fan_in))
        return jax.random.uniform(next(keys), shape, jnp.float32, -bound, bound)

    p = {}
    p["embedding"] = u((VOCAB, 1), 1)                    # nn.Embedding(30000, 1)
    # LSTM: 2 layers, bidirectional, input sizes 1 and 2H (pre-transposed)
    for layer, din in ((0, 1), (1, 2 * H)):
        for suf in ("", "_rev"):
            p[f"w_ih_l{layer}{suf}"] = u((din, 4 * H), H)
            p[f"w_hh_l{layer}{suf}"] = u((H, 4 * H), H)
            p[f"b_l{layer}{suf}"] = u((1, 4 * H), H) + u((1, 4 * H), H)
    # one-hot embedding linears (stored as [1, in_features] rows)
    p["wp"], p["bp"] = u((1, 13), 13), u((1, 1), 13)
    p["wr"], p["br"] = u((1, 2), 2), u((1, 1), 2)
    p["wb"], p["bb"] = u((1, 10), 10), u((1, 1), 10)
    p["wh"], p["bh"] = u((1, 3), 3), u((1, 1), 3)
    # listings MLP 14 -> 8 -> 1
    p["w1"], p["b1"] = u((14, 8), 14), u((1, 8), 14)
    p["w2"], p["b2"] = u((1, 8), 8), u((1, 1), 8)
    # lstm_output Linear(2H -> 1)
    p["wo"], p["bo"] = u((1, 2 * H), 2 * H), u((1, 1), 2 * H)
    # final_mlp Linear(2 -> 1)
    p["wf"], p["bf"] = u((1, 2), 2), u((1, 1), 2)
    return p


# --------------------------------------------------------------------------
# One-time weight folding / gate-column permutation (outside the jitted path)
# --------------------------------------------------------------------------
def _grouped(w, slot):
    """Scatter PyTorch gate blocks (i,f,g,o; each H wide) of w [r,4H] into the
    grouped 8H column layout [i_f i_b | f_f f_b | g_f g_b | o_f o_b] at
    direction `slot` (0 = fwd, 1 = bwd); other direction's columns are zero."""
    out = jnp.zeros((w.shape[0], 8 * H), jnp.float32)
    for g in range(4):
        out = out.at[:, (2 * g + slot) * H:(2 * g + slot + 1) * H].set(
            w[:, g * H:(g + 1) * H])
    return out


def pack_params(p):
    # layer-0 fused fwd+bwd parameters in grouped-gate columns
    p0 = jnp.concatenate([_grouped(p["w_ih_l0"], 0),
                          _grouped(p["w_ih_l0_rev"], 1),
                          _grouped(p["b_l0"], 0) + _grouped(p["b_l0_rev"], 1)],
                         axis=0)                                       # [3, 8H]
    wbd = jnp.concatenate([_grouped(p["w_hh_l0"], 0),
                           _grouped(p["w_hh_l0_rev"], 1)], axis=0)     # [2H, 8H]
    # layer-1 parameters (standard i,f,g,o column order)
    wih1 = jnp.concatenate([p["w_ih_l1"], p["w_ih_l1_rev"]], axis=0)   # [4H, 4H]
    b1 = jnp.concatenate([p["b_l1"], p["b_l1_rev"]], axis=0)           # [2, 4H]
    wob = jnp.concatenate([p["wo"], p["bo"]], axis=1)                  # [1, 2H+1]

    # Exact fold of the four one-hot Linear(k->1) layers into listings_mlp:
    #   cat([num, prop@wp^T+bp, ...]) @ W1 + b1  ==  feat @ W_eff + b_eff
    w1 = p["w1"]
    w_eff = jnp.concatenate([
        w1[:NUM_RAW],
        p["wp"].T @ w1[NUM_RAW + 0:NUM_RAW + 1],
        p["wr"].T @ w1[NUM_RAW + 1:NUM_RAW + 2],
        p["wb"].T @ w1[NUM_RAW + 2:NUM_RAW + 3],
        p["wh"].T @ w1[NUM_RAW + 3:NUM_RAW + 4]], axis=0)              # [38, 8]
    b_eff = (p["b1"]
             + p["bp"] * w1[NUM_RAW + 0:NUM_RAW + 1]
             + p["br"] * w1[NUM_RAW + 1:NUM_RAW + 2]
             + p["bb"] * w1[NUM_RAW + 2:NUM_RAW + 3]
             + p["bh"] * w1[NUM_RAW + 3:NUM_RAW + 4])                  # [1, 8]
    tail = jnp.concatenate([p["b2"], p["wf"][:, 0:1], p["wf"][:, 1:2],
                            p["bf"], jnp.zeros((1, 4), jnp.float32)], axis=1)
    wpack = jnp.concatenate([w_eff, b_eff, p["w2"], tail], axis=0)     # [41, 8]

    return {"emb": p["embedding"], "p0": p0, "wbd": wbd, "wih1": wih1,
            "b1": b1, "whh1f": p["w_hh_l1"], "wob": wob, "wpack": wpack}


# --------------------------------------------------------------------------
# Full forward (mirrors LSTM_Baseline.forward) -> ONE pallas_call
# --------------------------------------------------------------------------
def forward(packed, numerical_input, review_ids, description_ids,
            neighborhood_ids, host_response_time_input, property_type_input,
            room_type_input, bathrooms_text_input):
    # description / neighborhood_overview are accepted but, exactly like the
    # reference forward, never contribute to the output.
    del description_ids, neighborhood_ids
    B, R, L = review_ids.shape
    N = B * R
    assert N <= NP, "pad/tile the review batch for more than 8 reviews total"

    # nn.Embedding(30000, 1) lookup, batch padded to 8 sublane-aligned rows.
    # TODO(synk): the gather stays in XLA -- a [30000,1] table lane-pads to
    # ~15 MiB in VMEM and dynamic per-lane extraction has no clean Pallas
    # lowering at this size, so in-kernel gather would be a net loss.
    ids = review_ids.reshape(N, L)
    if N < NP:
        ids = jnp.concatenate([ids, jnp.zeros((NP - N, L), ids.dtype)], axis=0)
    x_pad = packed["emb"][ids][..., 0].astype(jnp.float32)             # [NP, L]

    feat = jnp.concatenate([numerical_input, property_type_input,
                            room_type_input, bathrooms_text_input,
                            host_response_time_input], axis=1)         # [B, 38]

    return fused_forward(x_pad, packed["p0"], packed["wbd"], packed["wih1"],
                         packed["b1"], packed["whh1f"], packed["wob"],
                         feat, packed["wpack"], reviews=R)             # [B, 1]


if __name__ == "__main__":
    B, R, L = 2, 3, 8   # 2 properties, 3 reviews each, 8 tokens per review

    key = jax.random.PRNGKey(0)
    k_par, k_num, k_ids, k_host, k_prop, k_room, k_bath, k_d, k_n = \
        jax.random.split(key, 9)

    params = init_params(k_par)
    packed = pack_params(params)          # one-time fold / gate permutation

    numerical_input = jax.random.normal(k_num, (B, NUM_RAW), jnp.float32)
    review_ids = jax.random.randint(k_ids, (B, R, L), 0, VOCAB)       # tokenized reviews
    description_ids = jax.random.randint(k_d, (B, L), 0, VOCAB)       # unused (as in ref)
    neighborhood_ids = jax.random.randint(k_n, (B, L), 0, VOCAB)      # unused (as in ref)
    host_response_time_input = jax.random.normal(k_host, (B, 3), jnp.float32)
    property_type_input = jax.random.normal(k_prop, (B, 13), jnp.float32)
    room_type_input = jax.random.normal(k_room, (B, 2), jnp.float32)
    bathrooms_text_input = jax.random.normal(k_bath, (B, 10), jnp.float32)

    out = jax.jit(forward)(packed, numerical_input, review_ids,
                           description_ids, neighborhood_ids,
                           host_response_time_input, property_type_input,
                           room_type_input, bathrooms_text_input)
    out = jax.block_until_ready(out)
    assert out.shape == (B, 1) and out.dtype == jnp.float32
    print("KERNEL_OK")
</pallas_src>

<mosaic_0001>
module attributes {stable_mosaic.version = 11 : i64} {
  func.func @fused_kernel(%arg0: memref<8x8xf32, #tpu.memory_space<vmem>>, %arg1: memref<3x256xf32, #tpu.memory_space<vmem>>, %arg2: memref<64x256xf32, #tpu.memory_space<vmem>>, %arg3: memref<128x128xf32, #tpu.memory_space<vmem>>, %arg4: memref<2x128xf32, #tpu.memory_space<vmem>>, %arg5: memref<32x128xf32, #tpu.memory_space<vmem>>, %arg6: memref<1x65xf32, #tpu.memory_space<vmem>>, %arg7: memref<2x38xf32, #tpu.memory_space<vmem>>, %arg8: memref<41x8xf32, #tpu.memory_space<vmem>>, %arg9: memref<2x1xf32, #tpu.memory_space<vmem>>, %arg10: memref<8x8x256xf32, #tpu.memory_space<vmem>>, %arg11: memref<64x64xf32, #tpu.memory_space<vmem>>) attributes {dimension_semantics = [], scalar_prefetch = 0 : i64, scratch_operands = 2 : i64, tpu.core_type = #tpu.core_type<tc>} {
    %c0 = arith.constant 0 : index
    %c0_0 = arith.constant 0 : index
    %0 = vector.load %arg0[%c0, %c0_0] : memref<8x8xf32, #tpu.memory_space<vmem>>, vector<8x8xf32>
    %c0_1 = arith.constant 0 : index
    %c0_2 = arith.constant 0 : index
    %1 = vector.load %arg1[%c0_1, %c0_2] : memref<3x256xf32, #tpu.memory_space<vmem>>, vector<1x256xf32>
    %c1 = arith.constant 1 : index
    %c0_3 = arith.constant 0 : index
    %2 = vector.load %arg1[%c1, %c0_3] : memref<3x256xf32, #tpu.memory_space<vmem>>, vector<1x256xf32>
    %c2 = arith.constant 2 : index
    %c0_4 = arith.constant 0 : index
    %3 = vector.load %arg1[%c2, %c0_4] : memref<3x256xf32, #tpu.memory_space<vmem>>, vector<1x256xf32>
    %4 = vector.extract_strided_slice %0 {offsets = [0, 0], sizes = [8, 1], strides = [1, 1]} : vector<8x8xf32> to vector<8x1xf32>
    %5 = vector.broadcast %4 : vector<8x1xf32> to vector<8x256xf32>
    %6 = vector.broadcast %1 : vector<1x256xf32> to vector<8x256xf32>
    %7 = arith.mulf %5, %6 : vector<8x256xf32>
    %8 = vector.extract_strided_slice %0 {offsets = [0, 7], sizes = [8, 1], strides = [1, 1]} : vector<8x8xf32> to vector<8x1xf32>
    %9 = vector.broadcast %8 : vector<8x1xf32> to vector<8x256xf32>
    %10 = vector.broadcast %2 : vector<1x256xf32> to vector<8x256xf32>
    %11 = arith.mulf %9, %10 : vector<8x256xf32>
    %12 = arith.addf %7, %11 : vector<8x256xf32>
    %13 = vector.broadcast %3 : vector<1x256xf32> to vector<8x256xf32>
    %14 = arith.addf %12, %13 : vector<8x256xf32>
    %c0_5 = arith.constant 0 : index
    %c0_6 = arith.constant 0 : index
    %c0_7 = arith.constant 0 : index
    %15 = vector.load %arg10[%c0_5, %c0_6, %c0_7] : memref<8x8x256xf32, #tpu.memory_space<vmem>>, vector<1x8x256xf32>
    %16 = vector.shape_cast %15 : vector<1x8x256xf32> to vector<8x256xf32>
    %17 = vector.shape_cast %14 : vector<8x256xf32> to vector<1x8x256xf32>
    tpu.vector_store %arg10[%c0_5, %c0_6, %c0_7], %17 {strides = array<i32>} : memref<8x8x256xf32, #tpu.memory_space<vmem>>, vector<1x8x256xf32>,
    %18 = vector.extract_strided_slice %0 {offsets = [0, 1], sizes = [8, 1], strides = [1, 1]} : vector<8x8xf32> to vector<8x1xf32>
    %19 = vector.broadcast %18 : vector<8x1xf32> to vector<8x256xf32>
    %20 = vector.broadcast %1 : vector<1x256xf32> to vector<8x256xf32>
    %21 = arith.mulf %19, %20 : vector<8x256xf32>
    %22 = vector.extract_strided_slice %0 {offsets = [0, 6], sizes = [8, 1], strides = [1, 1]} : vector<8x8xf32> to vector<8x1xf32>
    %23 = vector.broadcast %22 : vector<8x1xf32> to vector<8x256xf32>
    %24 = vector.broadcast %2 : vector<1x256xf32> to vector<8x256xf32>
    %25 = arith.mulf %23, %24 : vector<8x256xf32>
    %26 = arith.addf %21, %25 : vector<8x256xf32>
    %27 = vector.broadcast %3 : vector<1x256xf32> to vector<8x256xf32>
    %28 = arith.addf %26, %27 : vector<8x256xf32>
    %c1_8 = arith.constant 1 : index
    %c0_9 = arith.constant 0 : index
    %c0_10 = arith.constant 0 : index
    %29 = vector.load %arg10[%c1_8, %c0_9, %c0_10] : memref<8x8x256xf32, #tpu.memory_space<vmem>>, vector<1x8x256xf32>
    %30 = vector.shape_cast %29 : vector<1x8x256xf32> to vector<8x256xf32>
    %31 = vector.shape_cast %28 : vector<8x256xf32> to vector<1x8x256xf32>
    tpu.vector_store %arg10[%c1_8, %c0_9, %c0_10], %31 {strides = array<i32>} : memref<8x8x256xf32, #tpu.memory_space<vmem>>, vector<1x8x256xf32>,
    %32 = vector.extract_strided_slice %0 {offsets = [0, 2], sizes = [8, 1], strides = [1, 1]} : vector<8x8xf32> to vector<8x1xf32>
    %33 = vector.broadcast %32 : vector<8x1xf32> to vector<8x256xf32>
    %34 = vector.broadcast %1 : vector<1x256xf32> to vector<8x256xf32>
    %35 = arith.mulf %33, %34 : vector<8x256xf32>
    %36 = vector.extract_strided_slice %0 {offsets = [0, 5], sizes = [8, 1], strides = [1, 1]} : vector<8x8xf32> to vector<8x1xf32>
    %37 = vector.broadcast %36 : vector<8x1xf32> to vector<8x256xf32>
    %38 = vector.broadcast %2 : vector<1x256xf32> to vector<8x256xf32>
    %39 = arith.mulf %37, %38 : vector<8x256xf32>
    %40 = arith.addf %35, %39 : vector<8x256xf32>
    %41 = vector.broadcast %3 : vector<1x256xf32> to vector<8x256xf32>
    %42 = arith.addf %40, %41 : vector<8x256xf32>
    %c2_11 = arith.constant 2 : index
    %c0_12 = arith.constant 0 : index
    %c0_13 = arith.constant 0 : index
    %43 = vector.load %arg10[%c2_11, %c0_12, %c0_13] : memref<8x8x256xf32, #tpu.memory_space<vmem>>, vector<1x8x256xf32>
    %44 = vector.shape_cast %43 : vector<1x8x256xf32> to vector<8x256xf32>
    %45 = vector.shape_cast %42 : vector<8x256xf32> to vector<1x8x256xf32>
    tpu.vector_store %arg10[%c2_11, %c0_12, %c0_13], %45 {strides = array<i32>} : memref<8x8x256xf32, #tpu.memory_space<vmem>>, vector<1x8x256xf32>,
    %46 = vector.extract_strided_slice %0 {offsets = [0, 3], sizes = [8, 1], strides = [1, 1]} : vector<8x8xf32> to vector<8x1xf32>
    %47 = vector.broadcast %46 : vector<8x1xf32> to vector<8x256xf32>
    %48 = vector.broadcast %1 : vector<1x256xf32> to vector<8x256xf32>
    %49 = arith.mulf %47, %48 : vector<8x256xf32>
    %50 = vector.extract_strided_slice %0 {offsets = [0, 4], sizes = [8, 1], strides = [1, 1]} : vector<8x8xf32> to vector<8x1xf32>
    %51 = vector.broadcast %50 : vector<8x1xf32> to vector<8x256xf32>
    %52 = vector.broadcast %2 : vector<1x256xf32> to vector<8x256xf32>
    %53 = arith.mulf %51, %52 : vector<8x256xf32>
    %54 = arith.addf %49, %53 : vector<8x256xf32>
    %55 = vector.broadcast %3 : vector<1x256xf32> to vector<8x256xf32>
    %56 = arith.addf %54, %55 : vector<8x256xf32>
    %c3 = arith.constant 3 : index
    %c0_14 = arith.constant 0 : index
    %c0_15 = arith.constant 0 : index
    %57 = vector.load %arg10[%c3, %c0_14, %c0_15] : memref<8x8x256xf32, #tpu.memory_space<vmem>>, vector<1x8x256xf32>
    %58 = vector.shape_cast %57 : vector<1x8x256xf32> to vector<8x256xf32>
    %59 = vector.shape_cast %56 : vector<8x256xf32> to vector<1x8x256xf32>
    tpu.vector_store %arg10[%c3, %c0_14, %c0_15], %59 {strides = array<i32>} : memref<8x8x256xf32, #tpu.memory_space<vmem>>, vector<1x8x256xf32>,
    %60 = vector.extract_strided_slice %0 {offsets = [0, 4], sizes = [8, 1], strides = [1, 1]} : vector<8x8xf32> to vector<8x1xf32>
    %61 = vector.broadcast %60 : vector<8x1xf32> to vector<8x256xf32>
    %62 = vector.broadcast %1 : vector<1x256xf32> to vector<8x256xf32>
    %63 = arith.mulf %61, %62 : vector<8x256xf32>
    %64 = vector.extract_strided_slice %0 {offsets = [0, 3], sizes = [8, 1], strides = [1, 1]} : vector<8x8xf32> to vector<8x1xf32>
    %65 = vector.broadcast %64 : vector<8x1xf32> to vector<8x256xf32>
    %66 = vector.broadcast %2 : vector<1x256xf32> to vector<8x256xf32>
    %67 = arith.mulf %65, %66 : vector<8x256xf32>
    %68 = arith.addf %63, %67 : vector<8x256xf32>
    %69 = vector.broadcast %3 : vector<1x256xf32> to vector<8x256xf32>
    %70 = arith.addf %68, %69 : vector<8x256xf32>
    %c4 = arith.constant 4 : index
    %c0_16 = arith.constant 0 : index
    %c0_17 = arith.constant 0 : index
    %71 = vector.load %arg10[%c4, %c0_16, %c0_17] : memref<8x8x256xf32, #tpu.memory_space<vmem>>, vector<1x8x256xf32>
    %72 = vector.shape_cast %71 : vector<1x8x256xf32> to vector<8x256xf32>
    %73 = vector.shape_cast %70 : vector<8x256xf32> to vector<1x8x256xf32>
    tpu.vector_store %arg10[%c4, %c0_16, %c0_17], %73 {strides = array<i32>} : memref<8x8x256xf32, #tpu.memory_space<vmem>>, vector<1x8x256xf32>,
    %74 = vector.extract_strided_slice %0 {offsets = [0, 5], sizes = [8, 1], strides = [1, 1]} : vector<8x8xf32> to vector<8x1xf32>
    %75 = vector.broadcast %74 : vector<8x1xf32> to vector<8x256xf32>
    %76 = vector.broadcast %1 : vector<1x256xf32> to vector<8x256xf32>
    %77 = arith.mulf %75, %76 : vector<8x256xf32>
    %78 = vector.extract_strided_slice %0 {offsets = [0, 2], sizes = [8, 1], strides = [1, 1]} : vector<8x8xf32> to vector<8x1xf32>
    %79 = vector.broadcast %78 : vector<8x1xf32> to vector<8x256xf32>
    %80 = vector.broadcast %2 : vector<1x256xf32> to vector<8x256xf32>
    %81 = arith.mulf %79, %80 : vector<8x256xf32>
    %82 = arith.addf %77, %81 : vector<8x256xf32>
    %83 = vector.broadcast %3 : vector<1x256xf32> to vector<8x256xf32>
    %84 = arith.addf %82, %83 : vector<8x256xf32>
    %c5 = arith.constant 5 : index
    %c0_18 = arith.constant 0 : index
    %c0_19 = arith.constant 0 : index
    %85 = vector.load %arg10[%c5, %c0_18, %c0_19] : memref<8x8x256xf32, #tpu.memory_space<vmem>>, vector<1x8x256xf32>
    %86 = vector.shape_cast %85 : vector<1x8x256xf32> to vector<8x256xf32>
    %87 = vector.shape_cast %84 : vector<8x256xf32> to vector<1x8x256xf32>
    tpu.vector_store %arg10[%c5, %c0_18, %c0_19], %87 {strides = array<i32>} : memref<8x8x256xf32, #tpu.memory_space<vmem>>, vector<1x8x256xf32>,
    %88 = vector.extract_strided_slice %0 {offsets = [0, 6], sizes = [8, 1], strides = [1, 1]} : vector<8x8xf32> to vector<8x1xf32>
    %89 = vector.broadcast %88 : vector<8x1xf32> to vector<8x256xf32>
    %90 = vector.broadcast %1 : vector<1x256xf32> to vector<8x256xf32>
    %91 = arith.mulf %89, %90 : vector<8x256xf32>
    %92 = vector.extract_strided_slice %0 {offsets = [0, 1], sizes = [8, 1], strides = [1, 1]} : vector<8x8xf32> to vector<8x1xf32>
    %93 = vector.broadcast %92 : vector<8x1xf32> to vector<8x256xf32>
    %94 = vector.broadcast %2 : vector<1x256xf32> to vector<8x256xf32>
    %95 = arith.mulf %93, %94 : vector<8x256xf32>
    %96 = arith.addf %91, %95 : vector<8x256xf32>
    %97 = vector.broadcast %3 : vector<1x256xf32> to vector<8x256xf32>
    %98 = arith.addf %96, %97 : vector<8x256xf32>
    %c6 = arith.constant 6 : index
    %c0_20 = arith.constant 0 : index
    %c0_21 = arith.constant 0 : index
    %99 = vector.load %arg10[%c6, %c0_20, %c0_21] : memref<8x8x256xf32, #tpu.memory_space<vmem>>, vector<1x8x256xf32>
    %100 = vector.shape_cast %99 : vector<1x8x256xf32> to vector<8x256xf32>
    %101 = vector.shape_cast %98 : vector<8x256xf32> to vector<1x8x256xf32>
    tpu.vector_store %arg10[%c6, %c0_20, %c0_21], %101 {strides = array<i32>} : memref<8x8x256xf32, #tpu.memory_space<vmem>>, vector<1x8x256xf32>,
    %102 = vector.extract_strided_slice %0 {offsets = [0, 7], sizes = [8, 1], strides = [1, 1]} : vector<8x8xf32> to vector<8x1xf32>
    %103 = vector.broadcast %102 : vector<8x1xf32> to vector<8x256xf32>
    %104 = vector.broadcast %1 : vector<1x256xf32> to vector<8x256xf32>
    %105 = arith.mulf %103, %104 : vector<8x256xf32>
    %106 = vector.extract_strided_slice %0 {offsets = [0, 0], sizes = [8, 1], strides = [1, 1]} : vector<8x8xf32> to vector<8x1xf32>
    %107 = vector.broadcast %106 : vector<8x1xf32> to vector<8x256xf32>
    %108 = vector.broadcast %2 : vector<1x256xf32> to vector<8x256xf32>
    %109 = arith.mulf %107, %108 : vector<8x256xf32>
    %110 = arith.addf %105, %109 : vector<8x256xf32>
    %111 = vector.broadcast %3 : vector<1x256xf32> to vector<8x256xf32>
    %112 = arith.addf %110, %111 : vector<8x256xf32>
    %c7 = arith.constant 7 : index
    %c0_22 = arith.constant 0 : index
    %c0_23 = arith.constant 0 : index
    %113 = vector.load %arg10[%c7, %c0_22, %c0_23] : memref<8x8x256xf32, #tpu.memory_space<vmem>>, vector<1x8x256xf32>
    %114 = vector.shape_cast %113 : vector<1x8x256xf32> to vector<8x256xf32>
    %115 = vector.shape_cast %112 : vector<8x256xf32> to vector<1x8x256xf32>
    tpu.vector_store %arg10[%c7, %c0_22, %c0_23], %115 {strides = array<i32>} : memref<8x8x256xf32, #tpu.memory_space<vmem>>, vector<1x8x256xf32>,
    %c0_24 = arith.constant 0 : index
    %c0_25 = arith.constant 0 : index
    %116 = vector.load %arg2[%c0_24, %c0_25] : memref<64x256xf32, #tpu.memory_space<vmem>>, vector<64x256xf32>
    %cst = arith.constant 0.000000e+00 : f32
    %117 = vector.broadcast %cst : f32 to vector<8x64xf32>
    %cst_26 = arith.constant 0.000000e+00 : f32
    %118 = vector.broadcast %cst_26 : f32 to vector<8x64xf32>
    %c0_27 = arith.constant 0 : index
    %c0_28 = arith.constant 0 : index
    %c0_29 = arith.constant 0 : index
    %119 = vector.load %arg10[%c0_27, %c0_28, %c0_29] : memref<8x8x256xf32, #tpu.memory_space<vmem>>, vector<1x8x256xf32>
    %120 = vector.shape_cast %119 : vector<1x8x256xf32> to vector<8x256xf32>
    %cst_30 = arith.constant dense<0.000000e+00> : vector<8x256xf32>
    %121 = tpu.matmul %117, %116, %cst_30 {dimension_numbers = #tpu.dot_dimension_numbers<[1], [0], [0], [1], [0, 0, 1, 1], [], []>} : vector<8x64xf32>, vector<64x256xf32>, vector<8x256xf32> -> vector<8x256xf32>
    %122 = arith.addf %120, %121 : vector<8x256xf32>
    %123 = arith.negf %122 : vector<8x256xf32>
    %124 = math.exp %123 : vector<8x256xf32>
    %cst_31 = arith.constant 1.000000e+00 : f32
    %125 = vector.broadcast %cst_31 : f32 to vector<8x256xf32>
    %126 = arith.addf %125, %124 : vector<8x256xf32>
    %127 = arith.divf %125, %126 : vector<8x256xf32>
    %128 = vector.extract_strided_slice %127 {offsets = [0, 0], sizes = [8, 64], strides = [1, 1]} : vector<8x256xf32> to vector<8x64xf32>
    %129 = vector.extract_strided_slice %127 {offsets = [0, 64], sizes = [8, 64], strides = [1, 1]} : vector<8x256xf32> to vector<8x64xf32>
    %130 = vector.extract_strided_slice %127 {offsets = [0, 192], sizes = [8, 64], strides = [1, 1]} : vector<8x256xf32> to vector<8x64xf32>
    %131 = vector.extract_strided_slice %122 {offsets = [0, 128], sizes = [8, 64], strides = [1, 1]} : vector<8x256xf32> to vector<8x64xf32>
    %132 = math.tanh %131 : vector<8x64xf32>
    %133 = arith.mulf %129, %118 : vector<8x64xf32>
    %134 = arith.mulf %128, %132 : vector<8x64xf32>
    %135 = arith.addf %133, %134 : vector<8x64xf32>
    %136 = math.tanh %135 : vector<8x64xf32>
    %137 = arith.mulf %130, %136 : vector<8x64xf32>
    %138 = vector.extract_strided_slice %137 {offsets = [0, 0], sizes = [8, 32], strides = [1, 1]} : vector<8x64xf32> to vector<8x32xf32>
    %c0_32 = arith.constant 0 : index
    %c0_33 = arith.constant 0 : index
    %139 = vector.load %arg11[%c0_32, %c0_33] : memref<64x64xf32, #tpu.memory_space<vmem>>, vector<8x32xf32>
    tpu.vector_store %arg11[%c0_32, %c0_33], %138 {strides = array<i32>} : memref<64x64xf32, #tpu.memory_space<vmem>>, vector<8x32xf32>,
    %140 = vector.extract_strided_slice %137 {offsets = [0, 32], sizes = [8, 32], strides = [1, 1]} : vector<8x64xf32> to vector<8x32xf32>
    %c56 = arith.constant 56 : index
    %c32 = arith.constant 32 : index
    %141 = vector.load %arg11[%c56, %c32] : memref<64x64xf32, #tpu.memory_space<vmem>>, vector<8x32xf32>
    tpu.vector_store %arg11[%c56, %c32], %140 {strides = array<i32>} : memref<64x64xf32, #tpu.memory_space<vmem>>, vector<8x32xf32>,
    %c1_34 = arith.constant 1 : index
    %c0_35 = arith.constant 0 : index
    %c0_36 = arith.constant 0 : index
    %142 = vector.load %arg10[%c1_34, %c0_35, %c0_36] : memref<8x8x256xf32, #tpu.memory_space<vmem>>, vector<1x8x256xf32>
    %143 = vector.shape_cast %142 : vector<1x8x256xf32> to vector<8x256xf32>
    %cst_37 = arith.constant dense<0.000000e+00> : vector<8x256xf32>
    %144 = tpu.matmul %137, %116, %cst_37 {dimension_numbers = #tpu.dot_dimension_numbers<[1], [0], [0], [1], [0, 0, 1, 1], [], []>} : vector<8x64xf32>, vector<64x256xf32>, vector<8x256xf32> -> vector<8x256xf32>
    %145 = arith.addf %143, %144 : vector<8x256xf32>
    %146 = arith.negf %145 : vector<8x256xf32>
    %147 = math.exp %146 : vector<8x256xf32>
    %cst_38 = arith.constant 1.000000e+00 : f32
    %148 = vector.broadcast %cst_38 : f32 to vector<8x256xf32>
    %149 = arith.addf %148, %147 : vector<8x256xf32>
    %150 = arith.divf %148, %149 : vector<8x256xf32>
    %151 = vector.extract_strided_slice %150 {offsets = [0, 0], sizes = [8, 64], strides = [1, 1]} : vector<8x256xf32> to vector<8x64xf32>
    %152 = vector.extract_strided_slice %150 {offsets = [0, 64], sizes = [8, 64], strides = [1, 1]} : vector<8x256xf32> to vector<8x64xf32>
    %153 = vector.extract_strided_slice %150 {offsets = [0, 192], sizes = [8, 64], strides = [1, 1]} : vector<8x256xf32> to vector<8x64xf32>
    %154 = vector.extract_strided_slice %145 {offsets = [0, 128], sizes = [8, 64], strides = [1, 1]} : vector<8x256xf32> to vector<8x64xf32>
    %155 = math.tanh %154 : vector<8x64xf32>
    %156 = arith.mulf %152, %135 : vector<8x64xf32>
    %157 = arith.mulf %151, %155 : vector<8x64xf32>
    %158 = arith.addf %156, %157 : vector<8x64xf32>
    %159 = math.tanh %158 : vector<8x64xf32>
    %160 = arith.mulf %153, %159 : vector<8x64xf32>
    %161 = vector.extract_strided_slice %160 {offsets = [0, 0], sizes = [8, 32], strides = [1, 1]} : vector<8x64xf32> to vector<8x32xf32>
    %c8 = arith.constant 8 : index
    %c0_39 = arith.constant 0 : index
    %162 = vector.load %arg11[%c8, %c0_39] : memref<64x64xf32, #tpu.memory_space<vmem>>, vector<8x32xf32>
    tpu.vector_store %arg11[%c8, %c0_39], %161 {strides = array<i32>} : memref<64x64xf32, #tpu.memory_space<vmem>>, vector<8x32xf32>,
    %163 = vector.extract_strided_slice %160 {offsets = [0, 32], sizes = [8, 32], strides = [1, 1]} : vector<8x64xf32> to vector<8x32xf32>
    %c48 = arith.constant 48 : index
    %c32_40 = arith.constant 32 : index
    %164 = vector.load %arg11[%c48, %c32_40] : memref<64x64xf32, #tpu.memory_space<vmem>>, vector<8x32xf32>
    tpu.vector_store %arg11[%c48, %c32_40], %163 {strides = array<i32>} : memref<64x64xf32, #tpu.memory_space<vmem>>, vector<8x32xf32>,
    %c2_41 = arith.constant 2 : index
    %c0_42 = arith.constant 0 : index
    %c0_43 = arith.constant 0 : index
    %165 = vector.load %arg10[%c2_41, %c0_42, %c0_43] : memref<8x8x256xf32, #tpu.memory_space<vmem>>, vector<1x8x256xf32>
    %166 = vector.shape_cast %165 : vector<1x8x256xf32> to vector<8x256xf32>
    %cst_44 = arith.constant dense<0.000000e+00> : vector<8x256xf32>
    %167 = tpu.matmul %160, %116, %cst_44 {dimension_numbers = #tpu.dot_dimension_numbers<[1], [0], [0], [1], [0, 0, 1, 1], [], []>} : vector<8x64xf32>, vector<64x256xf32>, vector<8x256xf32> -> vector<8x256xf32>
    %168 = arith.addf %166, %167 : vector<8x256xf32>
    %169 = arith.negf %168 : vector<8x256xf32>
    %170 = math.exp %169 : vector<8x256xf32>
    %cst_45 = arith.constant 1.000000e+00 : f32
    %171 = vector.broadcast %cst_45 : f32 to vector<8x256xf32>
    %172 = arith.addf %171, %170 : vector<8x256xf32>
    %173 = arith.divf %171, %172 : vector<8x256xf32>
    %174 = vector.extract_strided_slice %173 {offsets = [0, 0], sizes = [8, 64], strides = [1, 1]} : vector<8x256xf32> to vector<8x64xf32>
    %175 = vector.extract_strided_slice %173 {offsets = [0, 64], sizes = [8, 64], strides = [1, 1]} : vector<8x256xf32> to vector<8x64xf32>
    %176 = vector.extract_strided_slice %173 {offsets = [0, 192], sizes = [8, 64], strides = [1, 1]} : vector<8x256xf32> to vector<8x64xf32>
    %177 = vector.extract_strided_slice %168 {offsets = [0, 128], sizes = [8, 64], strides = [1, 1]} : vector<8x256xf32> to vector<8x64xf32>
    %178 = math.tanh %177 : vector<8x64xf32>
    %179 = arith.mulf %175, %158 : vector<8x64xf32>
    %180 = arith.mulf %174, %178 : vector<8x64xf32>
    %181 = arith.addf %179, %180 : vector<8x64xf32>
    %182 = math.tanh %181 : vector<8x64xf32>
    %183 = arith.mulf %176, %182 : vector<8x64xf32>
    %184 = vector.extract_strided_slice %183 {offsets = [0, 0], sizes = [8, 32], strides = [1, 1]} : vector<8x64xf32> to vector<8x32xf32>
    %c16 = arith.constant 16 : index
    %c0_46 = arith.constant 0 : index
    %185 = vector.load %arg11[%c16, %c0_46] : memref<64x64xf32, #tpu.memory_space<vmem>>, vector<8x32xf32>
    tpu.vector_store %arg11[%c16, %c0_46], %184 {strides = array<i32>} : memref<64x64xf32, #tpu.memory_space<vmem>>, vector<8x32xf32>,
    %186 = vector.extract_strided_slice %183 {offsets = [0, 32], sizes = [8, 32], strides = [1, 1]} : vector<8x64xf32> to vector<8x32xf32>
    %c40 = arith.constant 40 : index
    %c32_47 = arith.constant 32 : index
    %187 = vector.load %arg11[%c40, %c32_47] : memref<64x64xf32, #tpu.memory_space<vmem>>, vector<8x32xf32>
    tpu.vector_store %arg11[%c40, %c32_47], %186 {strides = array<i32>} : memref<64x64xf32, #tpu.memory_space<vmem>>, vector<8x32xf32>,
    %c3_48 = arith.constant 3 : index
    %c0_49 = arith.constant 0 : index
    %c0_50 = arith.constant 0 : index
    %188 = vector.load %arg10[%c3_48, %c0_49, %c0_50] : memref<8x8x256xf32, #tpu.memory_space<vmem>>, vector<1x8x256xf32>
    %189 = vector.shape_cast %188 : vector<1x8x256xf32> to vector<8x256xf32>
    %cst_51 = arith.constant dense<0.000000e+00> : vector<8x256xf32>
    %190 = tpu.matmul %183, %116, %cst_51 {dimension_numbers = #tpu.dot_dimension_numbers<[1], [0], [0], [1], [0, 0, 1, 1], [], []>} : vector<8x64xf32>, vector<64x256xf32>, vector<8x256xf32> -> vector<8x256xf32>
    %191 = arith.addf %189, %190 : vector<8x256xf32>
    %192 = arith.negf %191 : vector<8x256xf32>
    %193 = math.exp %192 : vector<8x256xf32>
    %cst_52 = arith.constant 1.000000e+00 : f32
    %194 = vector.broadcast %cst_52 : f32 to vector<8x256xf32>
    %195 = arith.addf %194, %193 : vector<8x256xf32>
    %196 = arith.divf %194, %195 : vector<8x256xf32>
    %197 = vector.extract_strided_slice %196 {offsets = [0, 0], sizes = [8, 64], strides = [1, 1]} : vector<8x256xf32> to vector<8x64xf32>
    %198 = vector.extract_strided_slice %196 {offsets = [0, 64], sizes = [8, 64], strides = [1, 1]} : vector<8x256xf32> to vector<8x64xf32>
    %199 = vector.extract_strided_slice %196 {offsets = [0, 192], sizes = [8, 64], strides = [1, 1]} : vector<8x256xf32> to vector<8x64xf32>
    %200 = vector.extract_strided_slice %191 {offsets = [0, 128], sizes = [8, 64], strides = [1, 1]} : vector<8x256xf32> to vector<8x64xf32>
    %201 = math.tanh %200 : vector<8x64xf32>
    %202 = arith.mulf %198, %181 : vector<8x64xf32>
    %203 = arith.mulf %197, %201 : vector<8x64xf32>
    %204 = arith.addf %202, %203 : vector<8x64xf32>
    %205 = math.tanh %204 : vector<8x64xf32>
    %206 = arith.mulf %199, %205 : vector<8x64xf32>
    %207 = vector.extract_strided_slice %206 {offsets = [0, 0], sizes = [8, 32], strides = [1, 1]} : vector<8x64xf32> to vector<8x32xf32>
    %c24 = arith.constant 24 : index
    %c0_53 = arith.constant 0 : index
    %208 = vector.load %arg11[%c24, %c0_53] : memref<64x64xf32, #tpu.memory_space<vmem>>, vector<8x32xf32>
    tpu.vector_store %arg11[%c24, %c0_53], %207 {strides = array<i32>} : memref<64x64xf32, #tpu.memory_space<vmem>>, vector<8x32xf32>,
    %209 = vector.extract_strided_slice %206 {offsets = [0, 32], sizes = [8, 32], strides = [1, 1]} : vector<8x64xf32> to vector<8x32xf32>
    %c32_54 = arith.constant 32 : index
    %c32_55 = arith.constant 32 : index
    %210 = vector.load %arg11[%c32_54, %c32_55] : memref<64x64xf32, #tpu.memory_space<vmem>>, vector<8x32xf32>
    tpu.vector_store %arg11[%c32_54, %c32_55], %209 {strides = array<i32>} : memref<64x64xf32, #tpu.memory_space<vmem>>, vector<8x32xf32>,
    %c4_56 = arith.constant 4 : index
    %c0_57 = arith.constant 0 : index
    %c0_58 = arith.constant 0 : index
    %211 = vector.load %arg10[%c4_56, %c0_57, %c0_58] : memref<8x8x256xf32, #tpu.memory_space<vmem>>, vector<1x8x256xf32>
    %212 = vector.shape_cast %211 : vector<1x8x256xf32> to vector<8x256xf32>
    %cst_59 = arith.constant dense<0.000000e+00> : vector<8x256xf32>
    %213 = tpu.matmul %206, %116, %cst_59 {dimension_numbers = #tpu.dot_dimension_numbers<[1], [0], [0], [1], [0, 0, 1, 1], [], []>} : vector<8x64xf32>, vector<64x256xf32>, vector<8x256xf32> -> vector<8x256xf32>
    %214 = arith.addf %212, %213 : vector<8x256xf32>
    %215 = arith.negf %214 : vector<8x256xf32>
    %216 = math.exp %215 : vector<8x256xf32>
    %cst_60 = arith.constant 1.000000e+00 : f32
    %217 = vector.broadcast %cst_60 : f32 to vector<8x256xf32>
    %218 = arith.addf %217, %216 : vector<8x256xf32>
    %219 = arith.divf %217, %218 : vector<8x256xf32>
    %220 = vector.extract_strided_slice %219 {offsets = [0, 0], sizes = [8, 64], strides = [1, 1]} : vector<8x256xf32> to vector<8x64xf32>
    %221 = vector.extract_strided_slice %219 {offsets = [0, 64], sizes = [8, 64], strides = [1, 1]} : vector<8x256xf32> to vector<8x64xf32>
    %222 = vector.extract_strided_slice %219 {offsets = [0, 192], sizes = [8, 64], strides = [1, 1]} : vector<8x256xf32> to vector<8x64xf32>
    %223 = vector.extract_strided_slice %214 {offsets = [0, 128], sizes = [8, 64], strides = [1, 1]} : vector<8x256xf32> to vector<8x64xf32>
    %224 = math.tanh %223 : vector<8x64xf32>
    %225 = arith.mulf %221, %204 : vector<8x64xf32>
    %226 = arith.mulf %220, %224 : vector<8x64xf32>
    %227 = arith.addf %225, %226 : vector<8x64xf32>
    %228 = math.tanh %227 : vector<8x64xf32>
    %229 = arith.mulf %222, %228 : vector<8x64xf32>
    %230 = vector.extract_strided_slice %229 {offsets = [0, 0], sizes = [8, 32], strides = [1, 1]} : vector<8x64xf32> to vector<8x32xf32>
    %c32_61 = arith.constant 32 : index
    %c0_62 = arith.constant 0 : index
    %231 = vector.load %arg11[%c32_61, %c0_62] : memref<64x64xf32, #tpu.memory_space<vmem>>, vector<8x32xf32>
    tpu.vector_store %arg11[%c32_61, %c0_62], %230 {strides = array<i32>} : memref<64x64xf32, #tpu.memory_space<vmem>>, vector<8x32xf32>,
    %232 = vector.extract_strided_slice %229 {offsets = [0, 32], sizes = [8, 32], strides = [1, 1]} : vector<8x64xf32> to vector<8x32xf32>
    %c24_63 = arith.constant 24 : index
    %c32_64 = arith.constant 32 : index
    %233 = vector.load %arg11[%c24_63, %c32_64] : memref<64x64xf32, #tpu.memory_space<vmem>>, vector<8x32xf32>
    tpu.vector_store %arg11[%c24_63, %c32_64], %232 {strides = array<i32>} : memref<64x64xf32, #tpu.memory_space<vmem>>, vector<8x32xf32>,
    %c5_65 = arith.constant 5 : index
    %c0_66 = arith.constant 0 : index
    %c0_67 = arith.constant 0 : index
    %234 = vector.load %arg10[%c5_65, %c0_66, %c0_67] : memref<8x8x256xf32, #tpu.memory_space<vmem>>, vector<1x8x256xf32>
    %235 = vector.shape_cast %234 : vector<1x8x256xf32> to vector<8x256xf32>
    %cst_68 = arith.constant dense<0.000000e+00> : vector<8x256xf32>
    %236 = tpu.matmul %229, %116, %cst_68 {dimension_numbers = #tpu.dot_dimension_numbers<[1], [0], [0], [1], [0, 0, 1, 1], [], []>} : vector<8x64xf32>, vector<64x256xf32>, vector<8x256xf32> -> vector<8x256xf32>
    %237 = arith.addf %235, %236 : vector<8x256xf32>
    %238 = arith.negf %237 : vector<8x256xf32>
    %239 = math.exp %238 : vector<8x256xf32>
    %cst_69 = arith.constant 1.000000e+00 : f32
    %240 = vector.broadcast %cst_69 : f32 to vector<8x256xf32>
    %241 = arith.addf %240, %239 : vector<8x256xf32>
    %242 = arith.divf %240, %241 : vector<8x256xf32>
    %243 = vector.extract_strided_slice %242 {offsets = [0, 0], sizes = [8, 64], strides = [1, 1]} : vector<8x256xf32> to vector<8x64xf32>
    %244 = vector.extract_strided_slice %242 {offsets = [0, 64], sizes = [8, 64], strides = [1, 1]} : vector<8x256xf32> to vector<8x64xf32>
    %245 = vector.extract_strided_slice %242 {offsets = [0, 192], sizes = [8, 64], strides = [1, 1]} : vector<8x256xf32> to vector<8x64xf32>
    %246 = vector.extract_strided_slice %237 {offsets = [0, 128], sizes = [8, 64], strides = [1, 1]} : vector<8x256xf32> to vector<8x64xf32>
    %247 = math.tanh %246 : vector<8x64xf32>
    %248 = arith.mulf %244, %227 : vector<8x64xf32>
    %249 = arith.mulf %243, %247 : vector<8x64xf32>
    %250 = arith.addf %248, %249 : vector<8x64xf32>
    %251 = math.tanh %250 : vector<8x64xf32>
    %252 = arith.mulf %245, %251 : vector<8x64xf32>
    %253 = vector.extract_strided_slice %252 {offsets = [0, 0], sizes = [8, 32], strides = [1, 1]} : vector<8x64xf32> to vector<8x32xf32>
    %c40_70 = arith.constant 40 : index
    %c0_71 = arith.constant 0 : index
    %254 = vector.load %arg11[%c40_70, %c0_71] : memref<64x64xf32, #tpu.memory_space<vmem>>, vector<8x32xf32>
    tpu.vector_store %arg11[%c40_70, %c0_71], %253 {strides = array<i32>} : memref<64x64xf32, #tpu.memory_space<vmem>>, vector<8x32xf32>,
    %255 = vector.extract_strided_slice %252 {offsets = [0, 32], sizes = [8, 32], strides = [1, 1]} : vector<8x64xf32> to vector<8x32xf32>
    %c16_72 = arith.constant 16 : index
    %c32_73 = arith.constant 32 : index
    %256 = vector.load %arg11[%c16_72, %c32_73] : memref<64x64xf32, #tpu.memory_space<vmem>>, vector<8x32xf32>
    tpu.vector_store %arg11[%c16_72, %c32_73], %255 {strides = array<i32>} : memref<64x64xf32, #tpu.memory_space<vmem>>, vector<8x32xf32>,
    %c6_74 = arith.constant 6 : index
    %c0_75 = arith.constant 0 : index
    %c0_76 = arith.constant 0 : index
    %257 = vector.load %arg10[%c6_74, %c0_75, %c0_76] : memref<8x8x256xf32, #tpu.memory_space<vmem>>, vector<1x8x256xf32>
    %258 = vector.shape_cast %257 : vector<1x8x256xf32> to vector<8x256xf32>
    %cst_77 = arith.constant dense<0.000000e+00> : vector<8x256xf32>
    %259 = tpu.matmul %252, %116, %cst_77 {dimension_numbers = #tpu.dot_dimension_numbers<[1], [0], [0], [1], [0, 0, 1, 1], [], []>} : vector<8x64xf32>, vector<64x256xf32>, vector<8x256xf32> -> vector<8x256xf32>
    %260 = arith.addf %258, %259 : vector<8x256xf32>
    %261 = arith.negf %260 : vector<8x256xf32>
    %262 = math.exp %261 : vector<8x256xf32>
    %cst_78 = arith.constant 1.000000e+00 : f32
    %263 = vector.broadcast %cst_78 : f32 to vector<8x256xf32>
    %264 = arith.addf %263, %262 : vector<8x256xf32>
    %265 = arith.divf %263, %264 : vector<8x256xf32>
    %266 = vector.extract_strided_slice %265 {offsets = [0, 0], sizes = [8, 64], strides = [1, 1]} : vector<8x256xf32> to vector<8x64xf32>
    %267 = vector.extract_strided_slice %265 {offsets = [0, 64], sizes = [8, 64], strides = [1, 1]} : vector<8x256xf32> to vector<8x64xf32>
    %268 = vector.extract_strided_slice %265 {offsets = [0, 192], sizes = [8, 64], strides = [1, 1]} : vector<8x256xf32> to vector<8x64xf32>
    %269 = vector.extract_strided_slice %260 {offsets = [0, 128], sizes = [8, 64], strides = [1, 1]} : vector<8x256xf32> to vector<8x64xf32>
    %270 = math.tanh %269 : vector<8x64xf32>
    %271 = arith.mulf %267, %250 : vector<8x64xf32>
    %272 = arith.mulf %266, %270 : vector<8x64xf32>
    %273 = arith.addf %271, %272 : vector<8x64xf32>
    %274 = math.tanh %273 : vector<8x64xf32>
    %275 = arith.mulf %268, %274 : vector<8x64xf32>
    %276 = vector.extract_strided_slice %275 {offsets = [0, 0], sizes = [8, 32], strides = [1, 1]} : vector<8x64xf32> to vector<8x32xf32>
    %c48_79 = arith.constant 48 : index
    %c0_80 = arith.constant 0 : index
    %277 = vector.load %arg11[%c48_79, %c0_80] : memref<64x64xf32, #tpu.memory_space<vmem>>, vector<8x32xf32>
    tpu.vector_store %arg11[%c48_79, %c0_80], %276 {strides = array<i32>} : memref<64x64xf32, #tpu.memory_space<vmem>>, vector<8x32xf32>,
    %278 = vector.extract_strided_slice %275 {offsets = [0, 32], sizes = [8, 32], strides = [1, 1]} : vector<8x64xf32> to vector<8x32xf32>
    %c8_81 = arith.constant 8 : index
    %c32_82 = arith.constant 32 : index
    %279 = vector.load %arg11[%c8_81, %c32_82] : memref<64x64xf32, #tpu.memory_space<vmem>>, vector<8x32xf32>
    tpu.vector_store %arg11[%c8_81, %c32_82], %278 {strides = array<i32>} : memref<64x64xf32, #tpu.memory_space<vmem>>, vector<8x32xf32>,
    %c7_83 = arith.constant 7 : index
    %c0_84 = arith.constant 0 : index
    %c0_85 = arith.constant 0 : index
    %280 = vector.load %arg10[%c7_83, %c0_84, %c0_85] : memref<8x8x256xf32, #tpu.memory_space<vmem>>, vector<1x8x256xf32>
    %281 = vector.shape_cast %280 : vector<1x8x256xf32> to vector<8x256xf32>
    %cst_86 = arith.constant dense<0.000000e+00> : vector<8x256xf32>
    %282 = tpu.matmul %275, %116, %cst_86 {dimension_numbers = #tpu.dot_dimension_numbers<[1], [0], [0], [1], [0, 0, 1, 1], [], []>} : vector<8x64xf32>, vector<64x256xf32>, vector<8x256xf32> -> vector<8x256xf32>
    %283 = arith.addf %281, %282 : vector<8x256xf32>
    %284 = arith.negf %283 : vector<8x256xf32>
    %285 = math.exp %284 : vector<8x256xf32>
    %cst_87 = arith.constant 1.000000e+00 : f32
    %286 = vector.broadcast %cst_87 : f32 to vector<8x256xf32>
    %287 = arith.addf %286, %285 : vector<8x256xf32>
    %288 = arith.divf %286, %287 : vector<8x256xf32>
    %289 = vector.extract_strided_slice %288 {offsets = [0, 0], sizes = [8, 64], strides = [1, 1]} : vector<8x256xf32> to vector<8x64xf32>
    %290 = vector.extract_strided_slice %288 {offsets = [0, 64], sizes = [8, 64], strides = [1, 1]} : vector<8x256xf32> to vector<8x64xf32>
    %291 = vector.extract_strided_slice %288 {offsets = [0, 192], sizes = [8, 64], strides = [1, 1]} : vector<8x256xf32> to vector<8x64xf32>
    %292 = vector.extract_strided_slice %283 {offsets = [0, 128], sizes = [8, 64], strides = [1, 1]} : vector<8x256xf32> to vector<8x64xf32>
    %293 = math.tanh %292 : vector<8x64xf32>
    %294 = arith.mulf %290, %273 : vector<8x64xf32>
    %295 = arith.mulf %289, %293 : vector<8x64xf32>
    %296 = arith.addf %294, %295 : vector<8x64xf32>
    %297 = math.tanh %296 : vector<8x64xf32>
    %298 = arith.mulf %291, %297 : vector<8x64xf32>
    %299 = vector.extract_strided_slice %298 {offsets = [0, 0], sizes = [8, 32], strides = [1, 1]} : vector<8x64xf32> to vector<8x32xf32>
    %c56_88 = arith.constant 56 : index
    %c0_89 = arith.constant 0 : index
    %300 = vector.load %arg11[%c56_88, %c0_89] : memref<64x64xf32, #tpu.memory_space<vmem>>, vector<8x32xf32>
    tpu.vector_store %arg11[%c56_88, %c0_89], %299 {strides = array<i32>} : memref<64x64xf32, #tpu.memory_space<vmem>>, vector<8x32xf32>,
    %301 = vector.extract_strided_slice %298 {offsets = [0, 32], sizes = [8, 32], strides = [1, 1]} : vector<8x64xf32> to vector<8x32xf32>
    %c0_90 = arith.constant 0 : index
    %c32_91 = arith.constant 32 : index
    %302 = vector.load %arg11[%c0_90, %c32_91] : memref<64x64xf32, #tpu.memory_space<vmem>>, vector<8x32xf32>
    tpu.vector_store %arg11[%c0_90, %c32_91], %301 {strides = array<i32>} : memref<64x64xf32, #tpu.memory_space<vmem>>, vector<8x32xf32>,
    %c0_92 = arith.constant 0 : index
    %c0_93 = arith.constant 0 : index
    %303 = vector.load %arg11[%c0_92, %c0_93] : memref<64x64xf32, #tpu.memory_space<vmem>>, vector<64x64xf32>
    %c0_94 = arith.constant 0 : index
    %c0_95 = arith.constant 0 : index
    %304 = vector.load %arg3[%c0_94, %c0_95] : memref<128x128xf32, #tpu.memory_space<vmem>>, vector<64x128xf32>
    %cst_96 = arith.constant dense<0.000000e+00> : vector<64x128xf32>
    %305 = tpu.matmul %303, %304, %cst_96 {dimension_numbers = #tpu.dot_dimension_numbers<[1], [0], [0], [1], [0, 0, 1, 1], [], []>} : vector<64x64xf32>, vector<64x128xf32>, vector<64x128xf32> -> vector<64x128xf32>
    %c0_97 = arith.constant 0 : index
    %c0_98 = arith.constant 0 : index
    %306 = vector.load %arg4[%c0_97, %c0_98] : memref<2x128xf32, #tpu.memory_space<vmem>>, vector<1x128xf32>
    %307 = vector.broadcast %306 : vector<1x128xf32> to vector<64x128xf32>
    %308 = arith.addf %305, %307 : vector<64x128xf32>
    %c0_99 = arith.constant 0 : index
    %c0_100 = arith.constant 0 : index
    %309 = vector.load %arg5[%c0_99, %c0_100] : memref<32x128xf32, #tpu.memory_space<vmem>>, vector<32x128xf32>
    %cst_101 = arith.constant 0.000000e+00 : f32
    %310 = vector.broadcast %cst_101 : f32 to vector<8x32xf32>
    %cst_102 = arith.constant 0.000000e+00 : f32
    %311 = vector.broadcast %cst_102 : f32 to vector<8x32xf32>
    %312 = vector.extract_strided_slice %308 {offsets = [0, 0], sizes = [8, 128], strides = [1, 1]} : vector<64x128xf32> to vector<8x128xf32>
    %cst_103 = arith.constant dense<0.000000e+00> : vector<8x128xf32>
    %313 = tpu.matmul %310, %309, %cst_103 {dimension_numbers = #tpu.dot_dimension_numbers<[1], [0], [0], [1], [0, 0, 1, 1], [], []>} : vector<8x32xf32>, vector<32x128xf32>, vector<8x128xf32> -> vector<8x128xf32>
    %314 = arith.addf %312, %313 : vector<8x128xf32>
    %315 = arith.negf %314 : vector<8x128xf32>
    %316 = math.exp %315 : vector<8x128xf32>
    %cst_104 = arith.constant 1.000000e+00 : f32
    %317 = vector.broadcast %cst_104 : f32 to vector<8x128xf32>
    %318 = arith.addf %317, %316 : vector<8x128xf32>
    %319 = arith.divf %317, %318 : vector<8x128xf32>
    %320 = vector.extract_strided_slice %319 {offsets = [0, 0], sizes = [8, 32], strides = [1, 1]} : vector<8x128xf32> to vector<8x32xf32>
    %321 = vector.extract_strided_slice %319 {offsets = [0, 32], sizes = [8, 32], strides = [1, 1]} : vector<8x128xf32> to vector<8x32xf32>
    %322 = vector.extract_strided_slice %319 {offsets = [0, 96], sizes = [8, 32], strides = [1, 1]} : vector<8x128xf32> to vector<8x32xf32>
    %323 = vector.extract_strided_slice %314 {offsets = [0, 64], sizes = [8, 32], strides = [1, 1]} : vector<8x128xf32> to vector<8x32xf32>
    %324 = math.tanh %323 : vector<8x32xf32>
    %325 = arith.mulf %321, %311 : vector<8x32xf32>
    %326 = arith.mulf %320, %324 : vector<8x32xf32>
    %327 = arith.addf %325, %326 : vector<8x32xf32>
    %328 = math.tanh %327 : vector<8x32xf32>
    %329 = arith.mulf %322, %328 : vector<8x32xf32>
    %330 = vector.extract_strided_slice %308 {offsets = [8, 0], sizes = [8, 128], strides = [1, 1]} : vector<64x128xf32> to vector<8x128xf32>
    %cst_105 = arith.constant dense<0.000000e+00> : vector<8x128xf32>
    %331 = tpu.matmul %329, %309, %cst_105 {dimension_numbers = #tpu.dot_dimension_numbers<[1], [0], [0], [1], [0, 0, 1, 1], [], []>} : vector<8x32xf32>, vector<32x128xf32>, vector<8x128xf32> -> vector<8x128xf32>
    %332 = arith.addf %330, %331 : vector<8x128xf32>
    %333 = arith.negf %332 : vector<8x128xf32>
    %334 = math.exp %333 : vector<8x128xf32>
    %cst_106 = arith.constant 1.000000e+00 : f32
    %335 = vector.broadcast %cst_106 : f32 to vector<8x128xf32>
    %336 = arith.addf %335, %334 : vector<8x128xf32>
    %337 = arith.divf %335, %336 : vector<8x128xf32>
    %338 = vector.extract_strided_slice %337 {offsets = [0, 0], sizes = [8, 32], strides = [1, 1]} : vector<8x128xf32> to vector<8x32xf32>
    %339 = vector.extract_strided_slice %337 {offsets = [0, 32], sizes = [8, 32], strides = [1, 1]} : vector<8x128xf32> to vector<8x32xf32>
    %340 = vector.extract_strided_slice %337 {offsets = [0, 96], sizes = [8, 32], strides = [1, 1]} : vector<8x128xf32> to vector<8x32xf32>
    %341 = vector.extract_strided_slice %332 {offsets = [0, 64], sizes = [8, 32], strides = [1, 1]} : vector<8x128xf32> to vector<8x32xf32>
    %342 = math.tanh %341 : vector<8x32xf32>
    %343 = arith.mulf %339, %327 : vector<8x32xf32>
    %344 = arith.mulf %338, %342 : vector<8x32xf32>
    %345 = arith.addf %343, %344 : vector<8x32xf32>
    %346 = math.tanh %345 : vector<8x32xf32>
    %347 = arith.mulf %340, %346 : vector<8x32xf32>
    %348 = vector.extract_strided_slice %308 {offsets = [16, 0], sizes = [8, 128], strides = [1, 1]} : vector<64x128xf32> to vector<8x128xf32>
    %cst_107 = arith.constant dense<0.000000e+00> : vector<8x128xf32>
    %349 = tpu.matmul %347, %309, %cst_107 {dimension_numbers = #tpu.dot_dimension_numbers<[1], [0], [0], [1], [0, 0, 1, 1], [], []>} : vector<8x32xf32>, vector<32x128xf32>, vector<8x128xf32> -> vector<8x128xf32>
    %350 = arith.addf %348, %349 : vector<8x128xf32>
    %351 = arith.negf %350 : vector<8x128xf32>
    %352 = math.exp %351 : vector<8x128xf32>
    %cst_108 = arith.constant 1.000000e+00 : f32
    %353 = vector.broadcast %cst_108 : f32 to vector<8x128xf32>
    %354 = arith.addf %353, %352 : vector<8x128xf32>
    %355 = arith.divf %353, %354 : vector<8x128xf32>
    %356 = vector.extract_strided_slice %355 {offsets = [0, 0], sizes = [8, 32], strides = [1, 1]} : vector<8x128xf32> to vector<8x32xf32>
    %357 = vector.extract_strided_slice %355 {offsets = [0, 32], sizes = [8, 32], strides = [1, 1]} : vector<8x128xf32> to vector<8x32xf32>
    %358 = vector.extract_strided_slice %355 {offsets = [0, 96], sizes = [8, 32], strides = [1, 1]} : vector<8x128xf32> to vector<8x32xf32>
    %359 = vector.extract_strided_slice %350 {offsets = [0, 64], sizes = [8, 32], strides = [1, 1]} : vector<8x128xf32> to vector<8x32xf32>
    %360 = math.tanh %359 : vector<8x32xf32>
    %361 = arith.mulf %357, %345 : vector<8x32xf32>
    %362 = arith.mulf %356, %360 : vector<8x32xf32>
    %363 = arith.addf %361, %362 : vector<8x32xf32>
    %364 = math.tanh %363 : vector<8x32xf32>
    %365 = arith.mulf %358, %364 : vector<8x32xf32>
    %366 = vector.extract_strided_slice %308 {offsets = [24, 0], sizes = [8, 128], strides = [1, 1]} : vector<64x128xf32> to vector<8x128xf32>
    %cst_109 = arith.constant dense<0.000000e+00> : vector<8x128xf32>
    %367 = tpu.matmul %365, %309, %cst_109 {dimension_numbers = #tpu.dot_dimension_numbers<[1], [0], [0], [1], [0, 0, 1, 1], [], []>} : vector<8x32xf32>, vector<32x128xf32>, vector<8x128xf32> -> vector<8x128xf32>
    %368 = arith.addf %366, %367 : vector<8x128xf32>
    %369 = arith.negf %368 : vector<8x128xf32>
    %370 = math.exp %369 : vector<8x128xf32>
    %cst_110 = arith.constant 1.000000e+00 : f32
    %371 = vector.broadcast %cst_110 : f32 to vector<8x128xf32>
    %372 = arith.addf %371, %370 : vector<8x128xf32>
    %373 = arith.divf %371, %372 : vector<8x128xf32>
    %374 = vector.extract_strided_slice %373 {offsets = [0, 0], sizes = [8, 32], strides = [1, 1]} : vector<8x128xf32> to vector<8x32xf32>
    %375 = vector.extract_strided_slice %373 {offsets = [0, 32], sizes = [8, 32], strides = [1, 1]} : vector<8x128xf32> to vector<8x32xf32>
    %376 = vector.extract_strided_slice %373 {offsets = [0, 96], sizes = [8, 32], strides = [1, 1]} : vector<8x128xf32> to vector<8x32xf32>
    %377 = vector.extract_strided_slice %368 {offsets = [0, 64], sizes = [8, 32], strides = [1, 1]} : vector<8x128xf32> to vector<8x32xf32>
    %378 = math.tanh %377 : vector<8x32xf32>
    %379 = arith.mulf %375, %363 : vector<8x32xf32>
    %380 = arith.mulf %374, %378 : vector<8x32xf32>
    %381 = arith.addf %379, %380 : vector<8x32xf32>
    %382 = math.tanh %381 : vector<8x32xf32>
    %383 = arith.mulf %376, %382 : vector<8x32xf32>
    %384 = vector.extract_strided_slice %308 {offsets = [32, 0], sizes = [8, 128], strides = [1, 1]} : vector<64x128xf32> to vector<8x128xf32>
    %cst_111 = arith.constant dense<0.000000e+00> : vector<8x128xf32>
    %385 = tpu.matmul %383, %309, %cst_111 {dimension_numbers = #tpu.dot_dimension_numbers<[1], [0], [0], [1], [0, 0, 1, 1], [], []>} : vector<8x32xf32>, vector<32x128xf32>, vector<8x128xf32> -> vector<8x128xf32>
    %386 = arith.addf %384, %385 : vector<8x128xf32>
    %387 = arith.negf %386 : vector<8x128xf32>
    %388 = math.exp %387 : vector<8x128xf32>
    %cst_112 = arith.constant 1.000000e+00 : f32
    %389 = vector.broadcast %cst_112 : f32 to vector<8x128xf32>
    %390 = arith.addf %389, %388 : vector<8x128xf32>
    %391 = arith.divf %389, %390 : vector<8x128xf32>
    %392 = vector.extract_strided_slice %391 {offsets = [0, 0], sizes = [8, 32], strides = [1, 1]} : vector<8x128xf32> to vector<8x32xf32>
    %393 = vector.extract_strided_slice %391 {offsets = [0, 32], sizes = [8, 32], strides = [1, 1]} : vector<8x128xf32> to vector<8x32xf32>
    %394 = vector.extract_strided_slice %391 {offsets = [0, 96], sizes = [8, 32], strides = [1, 1]} : vector<8x128xf32> to vector<8x32xf32>
    %395 = vector.extract_strided_slice %386 {offsets = [0, 64], sizes = [8, 32], strides = [1, 1]} : vector<8x128xf32> to vector<8x32xf32>
    %396 = math.tanh %395 : vector<8x32xf32>
    %397 = arith.mulf %393, %381 : vector<8x32xf32>
    %398 = arith.mulf %392, %396 : vector<8x32xf32>
    %399 = arith.addf %397, %398 : vector<8x32xf32>
    %400 = math.tanh %399 : vector<8x32xf32>
    %401 = arith.mulf %394, %400 : vector<8x32xf32>
    %402 = vector.extract_strided_slice %308 {offsets = [40, 0], sizes = [8, 128], strides = [1, 1]} : vector<64x128xf32> to vector<8x128xf32>
    %cst_113 = arith.constant dense<0.000000e+00> : vector<8x128xf32>
    %403 = tpu.matmul %401, %309, %cst_113 {dimension_numbers = #tpu.dot_dimension_numbers<[1], [0], [0], [1], [0, 0, 1, 1], [], []>} : vector<8x32xf32>, vector<32x128xf32>, vector<8x128xf32> -> vector<8x128xf32>
    %404 = arith.addf %402, %403 : vector<8x128xf32>
    %405 = arith.negf %404 : vector<8x128xf32>
    %406 = math.exp %405 : vector<8x128xf32>
    %cst_114 = arith.constant 1.000000e+00 : f32
    %407 = vector.broadcast %cst_114 : f32 to vector<8x128xf32>
    %408 = arith.addf %407, %406 : vector<8x128xf32>
    %409 = arith.divf %407, %408 : vector<8x128xf32>
    %410 = vector.extract_strided_slice %409 {offsets = [0, 0], sizes = [8, 32], strides = [1, 1]} : vector<8x128xf32> to vector<8x32xf32>
    %411 = vector.extract_strided_slice %409 {offsets = [0, 32], sizes = [8, 32], strides = [1, 1]} : vector<8x128xf32> to vector<8x32xf32>
    %412 = vector.extract_strided_slice %409 {offsets = [0, 96], sizes = [8, 32], strides = [1, 1]} : vector<8x128xf32> to vector<8x32xf32>
    %413 = vector.extract_strided_slice %404 {offsets = [0, 64], sizes = [8, 32], strides = [1, 1]} : vector<8x128xf32> to vector<8x32xf32>
    %414 = math.tanh %413 : vector<8x32xf32>
    %415 = arith.mulf %411, %399 : vector<8x32xf32>
    %416 = arith.mulf %410, %414 : vector<8x32xf32>
    %417 = arith.addf %415, %416 : vector<8x32xf32>
    %418 = math.tanh %417 : vector<8x32xf32>
    %419 = arith.mulf %412, %418 : vector<8x32xf32>
    %420 = vector.extract_strided_slice %308 {offsets = [48, 0], sizes = [8, 128], strides = [1, 1]} : vector<64x128xf32> to vector<8x128xf32>
    %cst_115 = arith.constant dense<0.000000e+00> : vector<8x128xf32>
    %421 = tpu.matmul %419, %309, %cst_115 {dimension_numbers = #tpu.dot_dimension_numbers<[1], [0], [0], [1], [0, 0, 1, 1], [], []>} : vector<8x32xf32>, vector<32x128xf32>, vector<8x128xf32> -> vector<8x128xf32>
    %422 = arith.addf %420, %421 : vector<8x128xf32>
    %423 = arith.negf %422 : vector<8x128xf32>
    %424 = math.exp %423 : vector<8x128xf32>
    %cst_116 = arith.constant 1.000000e+00 : f32
    %425 = vector.broadcast %cst_116 : f32 to vector<8x128xf32>
    %426 = arith.addf %425, %424 : vector<8x128xf32>
    %427 = arith.divf %425, %426 : vector<8x128xf32>
    %428 = vector.extract_strided_slice %427 {offsets = [0, 0], sizes = [8, 32], strides = [1, 1]} : vector<8x128xf32> to vector<8x32xf32>
    %429 = vector.extract_strided_slice %427 {offsets = [0, 32], sizes = [8, 32], strides = [1, 1]} : vector<8x128xf32> to vector<8x32xf32>
    %430 = vector.extract_strided_slice %427 {offsets = [0, 96], sizes = [8, 32], strides = [1, 1]} : vector<8x128xf32> to vector<8x32xf32>
    %431 = vector.extract_strided_slice %422 {offsets = [0, 64], sizes = [8, 32], strides = [1, 1]} : vector<8x128xf32> to vector<8x32xf32>
    %432 = math.tanh %431 : vector<8x32xf32>
    %433 = arith.mulf %429, %417 : vector<8x32xf32>
    %434 = arith.mulf %428, %432 : vector<8x32xf32>
    %435 = arith.addf %433, %434 : vector<8x32xf32>
    %436 = math.tanh %435 : vector<8x32xf32>
    %437 = arith.mulf %430, %436 : vector<8x32xf32>
    %438 = vector.extract_strided_slice %308 {offsets = [56, 0], sizes = [8, 128], strides = [1, 1]} : vector<64x128xf32> to vector<8x128xf32>
    %cst_117 = arith.constant dense<0.000000e+00> : vector<8x128xf32>
    %439 = tpu.matmul %437, %309, %cst_117 {dimension_numbers = #tpu.dot_dimension_numbers<[1], [0], [0], [1], [0, 0, 1, 1], [], []>} : vector<8x32xf32>, vector<32x128xf32>, vector<8x128xf32> -> vector<8x128xf32>
    %440 = arith.addf %438, %439 : vector<8x128xf32>
    %441 = arith.negf %440 : vector<8x128xf32>
    %442 = math.exp %441 : vector<8x128xf32>
    %cst_118 = arith.constant 1.000000e+00 : f32
    %443 = vector.broadcast %cst_118 : f32 to vector<8x128xf32>
    %444 = arith.addf %443, %442 : vector<8x128xf32>
    %445 = arith.divf %443, %444 : vector<8x128xf32>
    %446 = vector.extract_strided_slice %445 {offsets = [0, 0], sizes = [8, 32], strides = [1, 1]} : vector<8x128xf32> to vector<8x32xf32>
    %447 = vector.extract_strided_slice %445 {offsets = [0, 32], sizes = [8, 32], strides = [1, 1]} : vector<8x128xf32> to vector<8x32xf32>
    %448 = vector.extract_strided_slice %445 {offsets = [0, 96], sizes = [8, 32], strides = [1, 1]} : vector<8x128xf32> to vector<8x32xf32>
    %449 = vector.extract_strided_slice %440 {offsets = [0, 64], sizes = [8, 32], strides = [1, 1]} : vector<8x128xf32> to vector<8x32xf32>
    %450 = math.tanh %449 : vector<8x32xf32>
    %451 = arith.mulf %447, %435 : vector<8x32xf32>
    %452 = arith.mulf %446, %450 : vector<8x32xf32>
    %453 = arith.addf %451, %452 : vector<8x32xf32>
    %454 = math.tanh %453 : vector<8x32xf32>
    %455 = arith.mulf %448, %454 : vector<8x32xf32>
    %456 = vector.extract_strided_slice %303 {offsets = [56, 0], sizes = [8, 64], strides = [1, 1]} : vector<64x64xf32> to vector<8x64xf32>
    %c64 = arith.constant 64 : index
    %c0_119 = arith.constant 0 : index
    %457 = vector.load %arg3[%c64, %c0_119] : memref<128x128xf32, #tpu.memory_space<vmem>>, vector<64x128xf32>
    %cst_120 = arith.constant dense<0.000000e+00> : vector<8x128xf32>
    %458 = tpu.matmul %456, %457, %cst_120 {dimension_numbers = #tpu.dot_dimension_numbers<[1], [0], [0], [1], [0, 0, 1, 1], [], []>} : vector<8x64xf32>, vector<64x128xf32>, vector<8x128xf32> -> vector<8x128xf32>
    %c1_121 = arith.constant 1 : index
    %c0_122 = arith.constant 0 : index
    %459 = vector.load %arg4[%c1_121, %c0_122] : memref<2x128xf32, #tpu.memory_space<vmem>>, vector<1x128xf32>
    %460 = vector.broadcast %459 : vector<1x128xf32> to vector<8x128xf32>
    %461 = arith.addf %458, %460 : vector<8x128xf32>
    %cst_123 = arith.constant 0.000000e+00 : f32
    %462 = vector.broadcast %cst_123 : f32 to vector<8x32xf32>
    %463 = arith.negf %461 : vector<8x128xf32>
    %464 = math.exp %463 : vector<8x128xf32>
    %cst_124 = arith.constant 1.000000e+00 : f32
    %465 = vector.broadcast %cst_124 : f32 to vector<8x128xf32>
    %466 = arith.addf %465, %464 : vector<8x128xf32>
    %467 = arith.divf %465, %466 : vector<8x128xf32>
    %468 = vector.extract_strided_slice %467 {offsets = [0, 0], sizes = [8, 32], strides = [1, 1]} : vector<8x128xf32> to vector<8x32xf32>
    %469 = vector.extract_strided_slice %467 {offsets = [0, 32], sizes = [8, 32], strides = [1, 1]} : vector<8x128xf32> to vector<8x32xf32>
    %470 = vector.extract_strided_slice %467 {offsets = [0, 96], sizes = [8, 32], strides = [1, 1]} : vector<8x128xf32> to vector<8x32xf32>
    %471 = vector.extract_strided_slice %461 {offsets = [0, 64], sizes = [8, 32], strides = [1, 1]} : vector<8x128xf32> to vector<8x32xf32>
    %472 = math.tanh %471 : vector<8x32xf32>
    %473 = arith.mulf %469, %462 : vector<8x32xf32>
    %474 = arith.mulf %468, %472 : vector<8x32xf32>
    %475 = arith.addf %473, %474 : vector<8x32xf32>
    %476 = math.tanh %475 : vector<8x32xf32>
    %477 = arith.mulf %470, %476 : vector<8x32xf32>
    %c0_125 = arith.constant 0 : index
    %c0_126 = arith.constant 0 : index
    %478 = vector.load %arg6[%c0_125, %c0_126] : memref<1x65xf32, #tpu.memory_space<vmem>>, vector<1x32xf32>
    %479 = vector.broadcast %478 : vector<1x32xf32> to vector<8x32xf32>
    %480 = arith.mulf %455, %479 : vector<8x32xf32>
    %cst_127 = arith.constant dense<0.000000e+00> : vector<8xf32>
    %481 = vector.multi_reduction <add>, %480, %cst_127 [1] : vector<8x32xf32> to vector<8xf32>
    %482 = vector.shape_cast %481 : vector<8xf32> to vector<8x1xf32>
    %c0_128 = arith.constant 0 : index
    %c32_129 = arith.constant 32 : index
    %483 = vector.load %arg6[%c0_128, %c32_129] : memref<1x65xf32, #tpu.memory_space<vmem>>, vector<1x32xf32>
    %484 = vector.broadcast %483 : vector<1x32xf32> to vector<8x32xf32>
    %485 = arith.mulf %477, %484 : vector<8x32xf32>
    %cst_130 = arith.constant dense<0.000000e+00> : vector<8xf32>
    %486 = vector.multi_reduction <add>, %485, %cst_130 [1] : vector<8x32xf32> to vector<8xf32>
    %487 = vector.shape_cast %486 : vector<8xf32> to vector<8x1xf32>
    %488 = arith.addf %482, %487 : vector<8x1xf32>
    %c0_131 = arith.constant 0 : index
    %c64_132 = arith.constant 64 : index
    %489 = vector.load %arg6[%c0_131, %c64_132] : memref<1x65xf32, #tpu.memory_space<vmem>>, vector<1x1xf32>
    %490 = vector.broadcast %489 : vector<1x1xf32> to vector<8x1xf32>
    %491 = arith.addf %488, %490 : vector<8x1xf32>
    %492 = math.tanh %491 : vector<8x1xf32>
    %c0_133 = arith.constant 0 : index
    %c0_134 = arith.constant 0 : index
    %493 = vector.load %arg8[%c0_133, %c0_134] : memref<41x8xf32, #tpu.memory_space<vmem>>, vector<38x8xf32>
    %c38 = arith.constant 38 : index
    %c0_135 = arith.constant 0 : index
    %494 = vector.load %arg8[%c38, %c0_135] : memref<41x8xf32, #tpu.memory_space<vmem>>, vector<1x8xf32>
    %c39 = arith.constant 39 : index
    %c0_136 = arith.constant 0 : index
    %495 = vector.load %arg8[%c39, %c0_136] : memref<41x8xf32, #tpu.memory_space<vmem>>, vector<1x8xf32>
    %c40_137 = arith.constant 40 : index
    %c0_138 = arith.constant 0 : index
    %496 = vector.load %arg8[%c40_137, %c0_138] : memref<41x8xf32, #tpu.memory_space<vmem>>, vector<1x8xf32>
    %c0_139 = arith.constant 0 : index
    %c0_140 = arith.constant 0 : index
    %497 = vector.load %arg7[%c0_139, %c0_140] : memref<2x38xf32, #tpu.memory_space<vmem>>, vector<2x38xf32>
    %cst_141 = arith.constant dense<0.000000e+00> : vector<2x8xf32>
    %498 = tpu.matmul %497, %493, %cst_141 {dimension_numbers = #tpu.dot_dimension_numbers<[1], [0], [0], [1], [0, 0, 1, 1], [], []>} : vector<2x38xf32>, vector<38x8xf32>, vector<2x8xf32> -> vector<2x8xf32>
    %499 = vector.broadcast %494 : vector<1x8xf32> to vector<2x8xf32>
    %500 = arith.addf %498, %499 : vector<2x8xf32>
    %cst_142 = arith.constant 0.000000e+00 : f32
    %501 = vector.broadcast %cst_142 : f32 to vector<2x8xf32>
    %502 = arith.maximumf %500, %501 : vector<2x8xf32>
    %503 = vector.broadcast %495 : vector<1x8xf32> to vector<2x8xf32>
    %504 = arith.mulf %502, %503 : vector<2x8xf32>
    %cst_143 = arith.constant dense<0.000000e+00> : vector<2xf32>
    %505 = vector.multi_reduction <add>, %504, %cst_143 [1] : vector<2x8xf32> to vector<2xf32>
    %506 = vector.shape_cast %505 : vector<2xf32> to vector<2x1xf32>
    %507 = vector.extract_strided_slice %496 {offsets = [0, 0], sizes = [1, 1], strides = [1, 1]} : vector<1x8xf32> to vector<1x1xf32>
    %508 = vector.broadcast %507 : vector<1x1xf32> to vector<2x1xf32>
    %509 = arith.addf %506, %508 : vector<2x1xf32>
    %cst_144 = arith.constant 0.000000e+00 : f32
    %510 = vector.broadcast %cst_144 : f32 to vector<2x1xf32>
    %511 = arith.maximumf %509, %510 : vector<2x1xf32>
    %512 = vector.extract_strided_slice %492 {offsets = [0, 0], sizes = [1, 1], strides = [1, 1]} : vector<8x1xf32> to vector<1x1xf32>
    %513 = vector.extract_strided_slice %492 {offsets = [1, 0], sizes = [1, 1], strides = [1, 1]} : vector<8x1xf32> to vector<1x1xf32>
    %514 = arith.addf %512, %513 : vector<1x1xf32>
    %515 = vector.extract_strided_slice %492 {offsets = [2, 0], sizes = [1, 1], strides = [1, 1]} : vector<8x1xf32> to vector<1x1xf32>
    %516 = arith.addf %514, %515 : vector<1x1xf32>
    %cst_145 = arith.constant 0.333333343 : f32
    %517 = vector.broadcast %cst_145 : f32 to vector<1x1xf32>
    %518 = arith.mulf %516, %517 : vector<1x1xf32>
    %519 = vector.extract_strided_slice %511 {offsets = [0, 0], sizes = [1, 1], strides = [1, 1]} : vector<2x1xf32> to vector<1x1xf32>
    %520 = vector.extract_strided_slice %496 {offsets = [0, 1], sizes = [1, 1], strides = [1, 1]} : vector<1x8xf32> to vector<1x1xf32>
    %521 = arith.mulf %519, %520 : vector<1x1xf32>
    %522 = vector.extract_strided_slice %496 {offsets = [0, 2], sizes = [1, 1], strides = [1, 1]} : vector<1x8xf32> to vector<1x1xf32>
    %523 = arith.mulf %518, %522 : vector<1x1xf32>
    %524 = arith.addf %521, %523 : vector<1x1xf32>
    %525 = vector.extract_strided_slice %496 {offsets = [0, 3], sizes = [1, 1], strides = [1, 1]} : vector<1x8xf32> to vector<1x1xf32>
    %526 = arith.addf %524, %525 : vector<1x1xf32>
    %cst_146 = arith.constant 0.000000e+00 : f32
    %527 = vector.broadcast %cst_146 : f32 to vector<1x1xf32>
    %528 = arith.maximumf %526, %527 : vector<1x1xf32>
    %c0_147 = arith.constant 0 : index
    %c0_148 = arith.constant 0 : index
    %529 = vector.load %arg9[%c0_147, %c0_148] : memref<2x1xf32, #tpu.memory_space<vmem>>, vector<1x1xf32>
    tpu.vector_store %arg9[%c0_147, %c0_148], %528 {strides = array<i32>} : memref<2x1xf32, #tpu.memory_space<vmem>>, vector<1x1xf32>,
    %530 = vector.extract_strided_slice %492 {offsets = [3, 0], sizes = [1, 1], strides = [1, 1]} : vector<8x1xf32> to vector<1x1xf32>
    %531 = vector.extract_strided_slice %492 {offsets = [4, 0], sizes = [1, 1], strides = [1, 1]} : vector<8x1xf32> to vector<1x1xf32>
    %532 = arith.addf %530, %531 : vector<1x1xf32>
    %533 = vector.extract_strided_slice %492 {offsets = [5, 0], sizes = [1, 1], strides = [1, 1]} : vector<8x1xf32> to vector<1x1xf32>
    %534 = arith.addf %532, %533 : vector<1x1xf32>
    %cst_149 = arith.constant 0.333333343 : f32
    %535 = vector.broadcast %cst_149 : f32 to vector<1x1xf32>
    %536 = arith.mulf %534, %535 : vector<1x1xf32>
    %537 = vector.extract_strided_slice %511 {offsets = [1, 0], sizes = [1, 1], strides = [1, 1]} : vector<2x1xf32> to vector<1x1xf32>
    %538 = vector.extract_strided_slice %496 {offsets = [0, 1], sizes = [1, 1], strides = [1, 1]} : vector<1x8xf32> to vector<1x1xf32>
    %539 = arith.mulf %537, %538 : vector<1x1xf32>
    %540 = vector.extract_strided_slice %496 {offsets = [0, 2], sizes = [1, 1], strides = [1, 1]} : vector<1x8xf32> to vector<1x1xf32>
    %541 = arith.mulf %536, %540 : vector<1x1xf32>
    %542 = arith.addf %539, %541 : vector<1x1xf32>
    %543 = vector.extract_strided_slice %496 {offsets = [0, 3], sizes = [1, 1], strides = [1, 1]} : vector<1x8xf32> to vector<1x1xf32>
    %544 = arith.addf %542, %543 : vector<1x1xf32>
    %cst_150 = arith.constant 0.000000e+00 : f32
    %545 = vector.broadcast %cst_150 : f32 to vector<1x1xf32>
    %546 = arith.maximumf %544, %545 : vector<1x1xf32>
    %c1_151 = arith.constant 1 : index
    %c0_152 = arith.constant 0 : index
    %547 = vector.load %arg9[%c1_151, %c0_152] : memref<2x1xf32, #tpu.memory_space<vmem>>, vector<1x1xf32>
    tpu.vector_store %arg9[%c1_151, %c0_152], %546 {strides = array<i32>} : memref<2x1xf32, #tpu.memory_space<vmem>>, vector<1x1xf32>,
    return
  }
}

</mosaic_0001>

<bundles_post_ra>
// kernel: squeeze.1
= control target key start
LH: loop header
LB: loop body
LE: loop exit
PB: predicated region body
PF: predicated region fallthrough
CT: control target
= control target key end

     0   :  { %s66_s8 = smov 104   ;;  %vm7_vm0 = vcmask 64512   ;;  %s67_s11 = smov 112   ;;  %s117_s0 = inlined_call_operand.vmem [shape: f32[64], index: 0, kind: input, shape index: {}]   ;;  %s118_s1 = inlined_call_operand.vmem [shape: f32[8,8], index: 1, kind: output, shape index: {}]  }
   0x1   :  { %v4_v0 = vld [vmem:[%s117_s0] sm:$0x1]  ;;  %s65_s0 = smov 120   ;;  %s68_s12 = smov 96  }
   0x2   :  { %5 = vst [vmem:[#allocation0] sm:$0x1] %v4_v0  ;;  %s69_s13 = smov 88   ;;  %s70_s14 = smov 80  }
   0x3   :  { %s71_s15 = smov 72  }
   0x9   :  { %v9_v1 = vld [vmem:[#allocation0] sm:$0x1]  }
   0xa   :  { %v21_v2 = vld [vmem:[#allocation0] sm:$0x1]   ;;  %10 = vrot.lane.b32.xlu0 %v9_v1, %s65_s0 }
   0xb   :  { %22 = vrot.lane.b32.xlu1 %v21_v2, %s66_s8  ;;  %v15_v3 = vld [vmem:[#allocation0] sm:$0x1]  }
   0xc   :  { %v27_v4 = vld [vmem:[#allocation0] sm:$0x1]  }
   0xd   :  { %v6_v5 = vld [vmem:[#allocation0] sm:$0x1]  }
   0xe   :  { %8 = vst.msk [vmem:[%s118_s1] sm:$0x1] %vm7_vm0, %v6_v5   ;;  %16 = vrot.lane.b32.xlu0 %v15_v3, %s67_s11  ;;  %v33_v6 = vld [vmem:[#allocation0] sm:$0x1]  }
   0xf   :  { %28 = vrot.lane.b32.xlu1 %v27_v4, %s68_s12  ;;  %v39_v7 = vld [vmem:[#allocation0] sm:$0x1]  }
  0x10   :  { %v45_v8 = vld [vmem:[#allocation0] sm:$0x1]  }
  0x12   :  { %34 = vrot.lane.b32.xlu0 %v33_v6, %s69_s13 }
  0x13   :  { %40 = vrot.lane.b32.xlu1 %v39_v7, %s70_s14 }
  0x16   :  { %46 = vrot.lane.b32.xlu0 %v45_v8, %s71_s15 }
  0x7c   :  { %v11_v9 = vpop.permute.xlu0 %10  }
  0x7d   :  { %v23_v10 = vpop.permute.xlu1 %22   ;;  %51 = vst.msk [vmem:[%s118_s1 + $0x1] sm:$0x1] %vm7_vm0, %v11_v9  }
  0x7e   :  { %53 = vst.msk [vmem:[%s118_s1 + $0x3] sm:$0x1] %vm7_vm0, %v23_v10  }
  0x80   :  { %v17_v11 = vpop.permute.xlu0 %16  }
  0x81   :  { %v29_v12 = vpop.permute.xlu1 %28   ;;  %52 = vst.msk [vmem:[%s118_s1 + $0x2] sm:$0x1] %vm7_vm0, %v17_v11  }
  0x82   :  { %54 = vst.msk [vmem:[%s118_s1 + $0x4] sm:$0x1] %vm7_vm0, %v29_v12  }
  0x84   :  { %v35_v13 = vpop.permute.xlu0 %34  }
  0x85   :  { %v41_v14 = vpop.permute.xlu1 %40   ;;  %55 = vst.msk [vmem:[%s118_s1 + $0x5] sm:$0x1] %vm7_vm0, %v35_v13  }
  0x86   :  { %56 = vst.msk [vmem:[%s118_s1 + $0x6] sm:$0x1] %vm7_vm0, %v41_v14  }
  0x88   :  { %v47_v15 = vpop.permute.xlu0 %46  }
  0x89   :  { %57 = vst.msk [vmem:[%s118_s1 + $0x7] sm:$0x1] %vm7_vm0, %v47_v15  }

// kernel: forward.1
= control target key start
LH: loop header
LB: loop body
LE: loop exit
PB: predicated region body
PF: predicated region fallthrough
CT: control target
= control target key end

     0   :  { %v2985_v3 = vmov 0.0   ;;  %v2986_v4 = vmov 0   ;;  %v2987_v26 = vmov 7   ;;  %v44_v28 = vlaneseq  ;;  %s2997_s28 = smov 32   ;;  %s2998_s14 = smov 96   ;;  %s3602_s2 = inlined_call_operand.vmem [shape: f32[64,256], index: 2, kind: input, shape index: {}]   ;;  %s3603_s0 = inlined_call_operand.vmem [shape: f32[8,8], index: 0, kind: input, shape index: {}]   ;;  %s3604_s1 = inlined_call_operand.vmem [shape: f32[3,256], index: 1, kind: input, shape index: {}]   ;;  %s3605_s3 = inlined_call_operand.vmem [shape: f32[128,128], index: 3, kind: input, shape index: {}]   ;;  %s3606_s5 = inlined_call_operand.vmem [shape: f32[32,128], index: 5, kind: input, shape index: {}]   ;;  %s3607_s4 = inlined_call_operand.vmem [shape: f32[2,128], index: 4, kind: input, shape index: {}]   ;;  %s3608_s6 = inlined_call_operand.vmem [shape: f32[1,65], index: 6, kind: input, shape index: {}]   ;;  %s3609_s8 = inlined_call_operand.vmem [shape: f32[41,8], index: 8, kind: input, shape index: {}]   ;;  %s3610_s7 = inlined_call_operand.vmem [shape: f32[2,38], index: 7, kind: input, shape index: {}]   ;;  %s3611_s9 = inlined_call_operand.vmem [shape: f32[2,1], index: 9, kind: output, shape index: {}]  }
   0x1   :  { %v192_v0 = vld [vmem:[%s3602_s2 + $0x8] sm:$0xff]  ;;  %v194_v1 = vld [vmem:[%s3602_s2 + $0x18] sm:$0xff]  ;;  %v191_v2 = vld [vmem:[%s3602_s2] sm:$0xff]  ;;  %277 = vmatprep.mubr.f32.mxu0 %v2985_v3  ;;  %2807 = vset.pattern.permute.xlu0 %v2986_v4  ;;  %v2989_v4 = vmov 1   ;;  %vm312_vm0 = vcmask 261120   ;;  %vm314_vm1 = vcmask 523520  }
   0x2   :  { %v3062_v5 = vpack.c.bf16 %v194_v1, %v192_v0  ;;  %v193_v6 = vld [vmem:[%s3602_s2 + $0x10] sm:$0xff]  ;;  %v196_v7 = vld [vmem:[%s3602_s2 + $0x28] sm:$0xff]  ;;  %v198_v8 = vld [vmem:[%s3602_s2 + $0x38] sm:$0xff]  ;;  %384 = vmatprep.mubr.f32.mxu1 %v2985_v3  ;;  %v45_v29 = vshrl.u32 %v44_v28, 7  ;;  %2809 = vset.pattern.permute.xlu1 %v2989_v4  ;;  %vm209_vm2 = vcmask 523264   ;;  %vm2996_vm3 = vmmov 0  }
   0x3   :  { %v3074_v9 = vpack.c.bf16 %v193_v6, %v191_v2  ;;  %v3076_v10 = vpack.c.bf16 %v198_v8, %v196_v7  ;;  %v195_v11 = vld [vmem:[%s3602_s2 + $0x20] sm:$0xff]  ;;  %v197_v12 = vld [vmem:[%s3602_s2 + $0x30] sm:$0xff]  ;;  %v200_v13 = vld [vmem:[%s3602_s2 + $0x48] sm:$0xff]  ;;  %v2990_v6 = vmov 6   ;;  %vm2158_vm4 = vcmask 1045504   ;;  %s2999_s17 = smov 62  }
   0x4   :  { %2581 = vmatprep.subr.bf16.mxu0 %v3062_v5  ;;  %v202_v14 = vld [vmem:[%s3602_s2 + $0x58] sm:$0xff]  ;;  %2597 = vmatprep.subr.bf16.mxu1 %v3062_v5  ;;  %v3093_v15 = vpack.c.bf16 %v197_v12, %v195_v11  ;;  %v199_v17 = vld [vmem:[%s3602_s2 + $0x40] sm:$0xff]  ;;  %v201_v18 = vld [vmem:[%s3602_s2 + $0x50] sm:$0xff]  ;;  %v3155_v31 = vsub.s32 0, %v45_v29  ;;  %v50_v40 = vsub.s32 1, %v45_v29  ;;  %vm2154_vm5 = vcmask 310272  }
   0x5   :  { %2583 = vmatpush1.bf16.msra.mxu0 %v3074_v9  ;;  %2599 = vmatpush1.bf16.msra.mxu1 %v3074_v9  ;;  %v3097_v16 = vpack.c.bf16 %v202_v14, %v200_v13  ;;  %v3108_v19 = vld [vmem:[%s3603_s0] sm:$0xff]  ;;  %v204_v20 = vld [vmem:[%s3602_s2 + $0x68] sm:$0xff]  ;;  %v206_v21 = vld [vmem:[%s3602_s2 + $0x78] sm:$0xff]  ;;  %v3119_v22 = vpack.c.bf16 %v201_v18, %v199_v17  ;;  %s3001_s0 = smov 125   ;;  %vm2238_vm6 = vcmask 58368   ;;  %vm2275_vm7 = vcmask 0  }
   0x6   :  { %2585 = vmatprep.subr.bf16.mxu0 %v3076_v10  ;;  %2601 = vmatprep.subr.bf16.mxu1 %v3076_v10  ;;  %v3123_v23 = vpack.c.bf16 %v206_v21, %v204_v20  ;;  %v203_v24 = vld [vmem:[%s3602_s2 + $0x60] sm:$0xff]  ;;  %v205_v25 = vld [vmem:[%s3602_s2 + $0x70] sm:$0xff]  ;;  %vm2298_vm8 = vcmask 1025  }
   0x7   :  { %40 = vperm.xlu0 %2807, %v3108_v19   ;;  %v3134_v27 = vpack.c.bf16 %v205_v25, %v203_v24  ;;  %v33_v32 = vld [vmem:[%s3604_s1] ss:$4 sm:$0x3]  ;;  %v2304_v33 = vld [vmem:[%s3604_s1 + $0x1] ss:$4 sm:$0x3] }
   0x8   :  { %v3164_v34 = vrot.slane %v33_v32, %v3155_v31  ;;  %v3167_v35 = vrot.slane %v2304_v33, %v3155_v31  ;;  %v2305_v39 = vld [vmem:[%s3604_s1 + $0x2] ss:$4 sm:$0x3]  ;;  %v3181_v43 = vrot.slane %v33_v32, %v50_v40  ;;  %v3183_v44 = vrot.slane %v2304_v33, %v50_v40  ;;  %s2988_s1 = smov 64  }
   0x9   :  { %2587 = vmatpush1.bf16.msra.mxu0 %v3093_v15  ;;  %2603 = vmatpush1.bf16.msra.mxu1 %v3093_v15  ;;  %v3179_v42 = vrot.slane %v2305_v39, %v3155_v31  ;;  %v3190_v53 = vrot.slane %v2305_v39, %v50_v40 }
   0xa   :  { %2589 = vmatprep.subr.bf16.mxu0 %v3097_v16  ;;  %2605 = vmatprep.subr.bf16.mxu1 %v3097_v16 }
   0xb   :  { %2808 = vset.pattern.permute.xlu0 %v2987_v26 }
   0xc   :  { %57 = vperm.xlu0 %2808, %v3108_v19  }
   0xd   :  { %2591 = vmatpush1.bf16.msra.mxu0 %v3119_v22  ;;  %2607 = vmatpush1.bf16.msra.mxu1 %v3119_v22 }
   0xe   :  { %2593 = vmatprep.subr.bf16.mxu0 %v3123_v23  ;;  %2609 = vmatprep.subr.bf16.mxu1 %v3123_v23 }
  0x10   :  { %2810 = vset.pattern.permute.xlu0 %v2990_v6 }
  0x11   :  { %2595 = vmatpush1.bf16.msra.mxu0 %v3134_v27  ;;  %2611 = vmatpush1.bf16.msra.mxu1 %v3134_v27 }
  0x12   :  { %2613 = vmatprep.subr.bf16.mxu0 %v3062_v5  ;;  %2629 = vmatprep.subr.bf16.mxu1 %v3062_v5 }
  0x13   :  { %97 = vperm.xlu0 %2810, %v3108_v19  }
  0x14   :  { %278 = vmatmul.mubr.f32.vlgmr.msra.gmra.mrb[0].mxu0 %v2985_v3 }
  0x15   :  { %2615 = vmatpush1.bf16.msra.mxu0 %v3074_v9  ;;  %489 = vmatprep.mubr.f32.mxu0 %v2985_v3 }
  0x16   :  { %2617 = vmatprep.subr.bf16.mxu0 %v3076_v10 }
  0x19   :  { %2619 = vmatpush1.bf16.msra.mxu0 %v3093_v15 }
  0x1a   :  { %2621 = vmatprep.subr.bf16.mxu0 %v3097_v16 }
  0x1d   :  { %2623 = vmatpush1.bf16.msra.mxu0 %v3119_v22 }
  0x1e   :  { %2625 = vmatprep.subr.bf16.mxu0 %v3123_v23 }
  0x21   :  { %2627 = vmatpush1.bf16.msra.mxu0 %v3134_v27 }
  0x22   :  { %2645 = vmatprep.subr.bf16.mxu0 %v3062_v5 }
  0x86   :  { %v3153_v30 = vpop.permute.xlu0 %40 }
  0x87   :  { %v54_v37 = vmul.f32 %v3164_v34, %v3153_v30  ;;  %v55_v49 = vmul.f32 %v3181_v43, %v3153_v30 }
  0x8b   :  { %v3169_v36 = vpop.permute.xlu0 %57 }
  0x8c   :  { %v71_v38 = vmul.f32 %v3167_v35, %v3169_v36  ;;  %v72_v50 = vmul.f32 %v3183_v44, %v3169_v36 }
  0x8e   :  { %v73_v41 = vadd.f32 %v71_v38, %v54_v37  ;;  %v74_v52 = vadd.f32 %v72_v50, %v55_v49 }
  0x90   :  { %v86_v45 = vadd.f32 %v3179_v42, %v73_v41  ;;  %v87_v54 = vadd.f32 %v3190_v53, %v74_v52 }
  0x92   :  { %v3211_v14 = vpop.permute.xlu0 %97 }
  0x93   :  { %v100_v18 = vmul.f32 %v3211_v14, %v3167_v35  ;;  %v101_v26 = vmul.f32 %v3211_v14, %v3183_v44 }
  0xe7   :  { %v279_v46 = vpop.f32.mrb[0].mxu0 }
  0xe8   :  { %v284_v47 = vadd.f32 %v279_v46, %v86_v45  ;;  %v281_v48 = vpop.f32.mrb[1].mxu0 }
  0xe9   :  { %v285_v55 = vadd.f32 %v281_v48, %v87_v54  ;;  %v2991_v54 = vmov 2  }
  0xea   :  { %v2306_v51 = vmul.f32 -1.442695, %v284_v47  ;;  %2811 = vset.pattern.permute.xlu0 %v2991_v54 }
  0xeb   :  { %v2307_v61 = vmul.f32 -1.442695, %v285_v55  ;;  %110 = vperm.xlu0 %2811, %v3108_v19  }
  0xec   :  { %2815 = vpow2.f32 %v2306_v51 }
  0xed   :  { %2817 = vtanh.f32 %v285_v55  ;;  %v2992_v55 = vmov 5  }
  0xf6   :  { %v2816_v56 = vpop.eup %2815 }
  0xf7   :  { %v292_v57 = vadd.f32 1.0, %v2816_v56  ;;  %v2818_v58 = vpop.eup %2817 }
  0xf9   :  { %2819 = vrcp.f32 %v292_v57 }
  0xfa   :  { %2821 = vpow2.f32 %v2307_v61 }
 0x103   :  { %v2820_v59 = vpop.eup %2819 }
 0x104   :  { %v300_v60 = vmul.f32 %v2820_v59, %v2818_v58  ;;  %v2822_v62 = vpop.eup %2821  ;;  %v299_v0 = vmul.f32 0.0, %v2820_v59 }
 0x105   :  { %v293_v63 = vadd.f32 1.0, %v2822_v62 }
 0x106   :  { %302 = vrot.lane.b32.xlu1 %v300_v60, %s2988_s1 }
 0x107   :  { %2823 = vrcp.f32 %v293_v63 }
 0x111   :  { %v2824_v7 = vpop.eup %2823 }
 0x16a   :  { %v3241_v61 = vpop.permute.xlu0 %110 }
 0x16b   :  { %v113_v63 = vmul.f32 %v3241_v61, %v3164_v34  ;;  %v114_v6 = vmul.f32 %v3241_v61, %v3181_v43 }
 0x178   :  { %v303_v1 = vpop.permute.xlu1 %302 }
 0x179   :  { %v305_v2 = vadd.f32 %v303_v1, %v299_v0 }
 0x17b   :  { %2825 = vtanh.f32 %v305_v2 }
 0x185   :  { %v2826_v8 = vpop.eup %2825 }
 0x186   :  { %v307_v11 = vmul.f32 %v2826_v8, %v2824_v7 }
 0x188   :  { %309 = vrot.lane.b32.xlu1 %v307_v11, %s2988_s1 }
 0x18c   :  { %91 = vperm.xlu1 %2809, %v3108_v19  }
 0x190   :  { %2812 = vset.pattern.permute.xlu1 %v2992_v55 }
 0x1fa   :  { %v310_v12 = vpop.permute.xlu1 %309 }
 0x1fb   :  { %313 = vst.msk [vmem:[#allocation3] sm:$0xff] %vm312_vm0, %v310_v12  ;;  %2308 = vmatmul.mubr.msk.f32.vlgmr.msra.gmra.mrb[0].mxu1 %vm209_vm2, %v310_v12 }
 0x1fc   :  { %315 = vst.msk [vmem:[#allocation3 + $0x38] sm:$0xff] %vm314_vm1, %v310_v12  ;;  %2631 = vmatpush1.bf16.msra.mxu1 %v3074_v9  ;;  %594 = vmatprep.mubr.f32.mxu1 %v2985_v3 }
 0x1fd   :  { %2633 = vmatprep.subr.bf16.mxu1 %v3076_v10 }
 0x200   :  { %2635 = vmatpush1.bf16.msra.mxu1 %v3093_v15 }
 0x201   :  { %2637 = vmatprep.subr.bf16.mxu1 %v3097_v16 }
 0x204   :  { %2639 = vmatpush1.bf16.msra.mxu1 %v3119_v22 }
 0x205   :  { %2641 = vmatprep.subr.bf16.mxu1 %v3123_v23 }
 0x208   :  { %2643 = vmatpush1.bf16.msra.mxu1 %v3134_v27 }
 0x209   :  { %2661 = vmatprep.subr.bf16.mxu1 %v3062_v5 }
 0x20b   :  { %v3209_v13 = vpop.permute.xlu1 %91 }
 0x20c   :  { %v94_v17 = vmul.f32 %v3209_v13, %v3164_v34  ;;  %v95_v25 = vmul.f32 %v3209_v13, %v3181_v43 }
 0x20e   :  { %v102_v20 = vadd.f32 %v100_v18, %v94_v17  ;;  %v103_v33 = vadd.f32 %v101_v26, %v95_v25 }
 0x210   :  { %v104_v21 = vadd.f32 %v102_v20, %v3179_v42  ;;  %v105_v37 = vadd.f32 %v103_v33, %v3190_v53 }
 0x2ce   :  { %v386_v24 = vpop.f32.mrb[0].mxu1 }
 0x2cf   :  { %v391_v28 = vadd.f32 %v386_v24, %v104_v21  ;;  %v388_v29 = vpop.f32.mrb[1].mxu1 }
 0x2d0   :  { %v392_v38 = vadd.f32 %v388_v29, %v105_v37 }
 0x2d1   :  { %v2309_v32 = vmul.f32 -1.442695, %v391_v28 }
 0x2d2   :  { %v2310_v47 = vmul.f32 -1.442695, %v392_v38 }
 0x2d3   :  { %2827 = vpow2.f32 %v2309_v32 }
 0x2d4   :  { %2829 = vtanh.f32 %v392_v38 }
 0x2dd   :  { %v2828_v39 = vpop.eup %2827 }
 0x2de   :  { %v399_v40 = vadd.f32 1.0, %v2828_v39  ;;  %v2830_v41 = vpop.eup %2829  ;;  %v2993_v39 = vmov 4  }
 0x2df   :  { %2814 = vset.pattern.permute.xlu0 %v2993_v39 }
 0x2e0   :  { %2831 = vrcp.f32 %v399_v40  ;;  %v2994_v40 = vmov 3  }
 0x2e1   :  { %2833 = vpow2.f32 %v2310_v47 }
 0x2ea   :  { %v2832_v45 = vpop.eup %2831 }
 0x2eb   :  { %v407_v46 = vmul.f32 %v2832_v45, %v2830_v41  ;;  %v2834_v48 = vpop.eup %2833  ;;  %v406_v50 = vmul.f32 %v2832_v45, %v305_v2 }
 0x2ec   :  { %v400_v49 = vadd.f32 1.0, %v2834_v48 }
 0x2ed   :  { %409 = vrot.lane.b32.xlu1 %v407_v46, %s2988_s1 }
 0x2ee   :  { %2835 = vrcp.f32 %v400_v49 }
 0x2f8   :  { %v2836_v56 = vpop.eup %2835 }
 0x35f   :  { %v410_v51 = vpop.permute.xlu1 %409 }
 0x360   :  { %v412_v52 = vadd.f32 %v410_v51, %v406_v50 }
 0x362   :  { %2837 = vtanh.f32 %v412_v52 }
 0x36c   :  { %v2838_v57 = vpop.eup %2837 }
 0x36d   :  { %v414_v58 = vmul.f32 %v2838_v57, %v2836_v56 }
 0x36f   :  { %416 = vrot.lane.b32.xlu1 %v414_v58, %s2988_s1 }
 0x373   :  { %116 = vperm.xlu1 %2812, %v3108_v19  }
 0x377   :  { %2813 = vset.pattern.permute.xlu1 %v2994_v40 }
 0x3e1   :  { %v417_v59 = vpop.permute.xlu1 %416 }
 0x3e2   :  { %419 = vst.msk [vmem:[#allocation3 + $0x8] sm:$0xff] %vm312_vm0, %v417_v59  ;;  %2311 = vmatmul.mubr.msk.f32.vlgmr.msra.gmra.mrb[2].mxu0 %vm209_vm2, %v417_v59 }
 0x3e3   :  { %420 = vst.msk [vmem:[#allocation3 + $0x30] sm:$0xff] %vm314_vm1, %v417_v59  ;;  %2647 = vmatpush1.bf16.msra.mxu0 %v3074_v9  ;;  %699 = vmatprep.mubr.f32.mxu0 %v2985_v3 }
 0x3e4   :  { %2649 = vmatprep.subr.bf16.mxu0 %v3076_v10 }
 0x3e7   :  { %2651 = vmatpush1.bf16.msra.mxu0 %v3093_v15 }
 0x3e8   :  { %2653 = vmatprep.subr.bf16.mxu0 %v3097_v16 }
 0x3eb   :  { %2655 = vmatpush1.bf16.msra.mxu0 %v3119_v22 }
 0x3ec   :  { %2657 = vmatprep.subr.bf16.mxu0 %v3123_v23 }
 0x3ef   :  { %2659 = vmatpush1.bf16.msra.mxu0 %v3134_v27 }
 0x3f0   :  { %2677 = vmatprep.subr.bf16.mxu0 %v3062_v5 }
 0x3f2   :  { %v3239_v60 = vpop.permute.xlu1 %116 }
 0x3f3   :  { %v119_v62 = vmul.f32 %v3239_v60, %v3167_v35  ;;  %v120_v4 = vmul.f32 %v3239_v60, %v3183_v44 }
 0x3f5   :  { %v121_v0 = vadd.f32 %v119_v62, %v113_v63  ;;  %v122_v12 = vadd.f32 %v120_v4, %v114_v6 }
 0x3f7   :  { %v123_v1 = vadd.f32 %v121_v0, %v3179_v42  ;;  %v124_v17 = vadd.f32 %v122_v12, %v3190_v53 }
 0x4b5   :  { %v491_v2 = vpop.f32.mrb[2].mxu0 }
 0x4b6   :  { %v496_v7 = vadd.f32 %v491_v2, %v123_v1  ;;  %v493_v8 = vpop.f32.mrb[3].mxu0 }
 0x4b7   :  { %v497_v18 = vadd.f32 %v493_v8, %v124_v17 }
 0x4b8   :  { %v2312_v11 = vmul.f32 -1.442695, %v496_v7 }
 0x4b9   :  { %v2313_v28 = vmul.f32 -1.442695, %v497_v18 }
 0x4ba   :  { %2839 = vpow2.f32 %v2312_v11 }
 0x4bb   :  { %2841 = vtanh.f32 %v497_v18 }
 0x4c4   :  { %v2840_v20 = vpop.eup %2839 }
 0x4c5   :  { %v504_v21 = vadd.f32 1.0, %v2840_v20  ;;  %v2842_v24 = vpop.eup %2841 }
 0x4c7   :  { %2843 = vrcp.f32 %v504_v21 }
 0x4c8   :  { %2845 = vpow2.f32 %v2313_v28 }
 0x4d1   :  { %v2844_v25 = vpop.eup %2843 }
 0x4d2   :  { %v512_v26 = vmul.f32 %v2844_v25, %v2842_v24  ;;  %v2846_v29 = vpop.eup %2845  ;;  %v511_v33 = vmul.f32 %v2844_v25, %v412_v52 }
 0x4d3   :  { %v505_v32 = vadd.f32 1.0, %v2846_v29 }
 0x4d4   :  { %514 = vrot.lane.b32.xlu1 %v512_v26, %s2988_s1 }
 0x4d5   :  { %2847 = vrcp.f32 %v505_v32 }
 0x4d8   :  { %129 = vperm.xlu1 %2813, %v3108_v19  }
 0x4df   :  { %v2848_v41 = vpop.eup %2847 }
 0x546   :  { %v515_v37 = vpop.permute.xlu1 %514 }
 0x547   :  { %v517_v38 = vadd.f32 %v515_v37, %v511_v33 }
 0x549   :  { %2849 = vtanh.f32 %v517_v38 }
 0x553   :  { %v2850_v45 = vpop.eup %2849 }
 0x554   :  { %v519_v46 = vmul.f32 %v2850_v45, %v2848_v41 }
 0x556   :  { %521 = vrot.lane.b32.xlu0 %v519_v46, %s2988_s1 }
 0x55a   :  { %135 = vperm.xlu0 %2814, %v3108_v19   ;;  %v130_v19 = vpop.permute.xlu1 %129 }
 0x55b   :  { %v132_v49 = vmul.f32 %v130_v19, %v3164_v34  ;;  %v133_v55 = vmul.f32 %v130_v19, %v3181_v43  ;;  %v149_v26 = vmul.f32 %v130_v19, %v3167_v35  ;;  %v150_v39 = vmul.f32 %v130_v19, %v3183_v44 }
 0x5c8   :  { %v522_v47 = vpop.permute.xlu0 %521 }
 0x5c9   :  { %524 = vst.msk [vmem:[#allocation3 + $0x10] sm:$0xff] %vm312_vm0, %v522_v47  ;;  %2314 = vmatmul.mubr.msk.f32.vlgmr.msra.gmra.mrb[2].mxu1 %vm209_vm2, %v522_v47 }
 0x5ca   :  { %525 = vst.msk [vmem:[#allocation3 + $0x28] sm:$0xff] %vm314_vm1, %v522_v47  ;;  %2663 = vmatpush1.bf16.msra.mxu1 %v3074_v9  ;;  %804 = vmatprep.mubr.f32.mxu1 %v2985_v3 }
 0x5cb   :  { %2665 = vmatprep.subr.bf16.mxu1 %v3076_v10 }
 0x5ce   :  { %2667 = vmatpush1.bf16.msra.mxu1 %v3093_v15 }
 0x5cf   :  { %2669 = vmatprep.subr.bf16.mxu1 %v3097_v16 }
 0x5d2   :  { %2671 = vmatpush1.bf16.msra.mxu1 %v3119_v22 }
 0x5d3   :  { %2673 = vmatprep.subr.bf16.mxu1 %v3123_v23 }
 0x5d6   :  { %2675 = vmatpush1.bf16.msra.mxu1 %v3134_v27 }
 0x5d7   :  { %2693 = vmatprep.subr.bf16.mxu1 %v3062_v5 }
 0x5d9   :  { %v136_v48 = vpop.permute.xlu0 %135 }
 0x5da   :  { %v138_v50 = vmul.f32 %v136_v48, %v3167_v35  ;;  %v139_v56 = vmul.f32 %v136_v48, %v3183_v44  ;;  %v147_v28 = vmul.f32 %v136_v48, %v3164_v34  ;;  %v148_v40 = vmul.f32 %v136_v48, %v3181_v43 }
 0x5dc   :  { %v140_v51 = vadd.f32 %v138_v50, %v132_v49  ;;  %v141_v62 = vadd.f32 %v139_v56, %v133_v55  ;;  %v151_v29 = vadd.f32 %v149_v26, %v147_v28  ;;  %v152_v45 = vadd.f32 %v150_v39, %v148_v40 }
 0x5de   :  { %v142_v52 = vadd.f32 %v140_v51, %v3179_v42  ;;  %v143_v5 = vadd.f32 %v141_v62, %v3190_v53  ;;  %v153_v32 = vadd.f32 %v151_v29, %v3179_v42  ;;  %v154_v46 = vadd.f32 %v152_v45, %v3190_v53 }
 0x69c   :  { %v596_v54 = vpop.f32.mrb[2].mxu1 }
 0x69d   :  { %v601_v57 = vadd.f32 %v596_v54, %v142_v52  ;;  %v598_v58 = vpop.f32.mrb[3].mxu1 }
 0x69e   :  { %v602_v63 = vadd.f32 %v598_v58, %v143_v5 }
 0x69f   :  { %v2315_v59 = vmul.f32 -1.442695, %v601_v57 }
 0x6a0   :  { %v2316_v7 = vmul.f32 -1.442695, %v602_v63 }
 0x6a1   :  { %2851 = vpow2.f32 %v2315_v59 }
 0x6a2   :  { %2853 = vtanh.f32 %v602_v63 }
 0x6ab   :  { %v2852_v0 = vpop.eup %2851 }
 0x6ac   :  { %v609_v1 = vadd.f32 1.0, %v2852_v0  ;;  %v2854_v2 = vpop.eup %2853  ;;  %v158_v0 = vmul.f32 %v3239_v60, %v3164_v34 }
 0x6ae   :  { %2855 = vrcp.f32 %v609_v1 }
 0x6af   :  { %2857 = vpow2.f32 %v2316_v7 }
 0x6b8   :  { %v2856_v4 = vpop.eup %2855 }
 0x6b9   :  { %v617_v6 = vmul.f32 %v2856_v4, %v2854_v2  ;;  %v2858_v8 = vpop.eup %2857  ;;  %v616_v12 = vmul.f32 %v2856_v4, %v517_v38 }
 0x6ba   :  { %v610_v11 = vadd.f32 1.0, %v2858_v8 }
 0x6bb   :  { %619 = vrot.lane.b32.xlu1 %v617_v6, %s2988_s1 }
 0x6bc   :  { %2859 = vrcp.f32 %v610_v11 }
 0x6c6   :  { %v2860_v20 = vpop.eup %2859 }
 0x72d   :  { %v620_v17 = vpop.permute.xlu1 %619 }
 0x72e   :  { %v622_v18 = vadd.f32 %v620_v17, %v616_v12 }
 0x730   :  { %2861 = vtanh.f32 %v622_v18 }
 0x73a   :  { %v2862_v21 = vpop.eup %2861 }
 0x73b   :  { %v624_v24 = vmul.f32 %v2862_v21, %v2860_v20 }
 0x73d   :  { %626 = vrot.lane.b32.xlu1 %v624_v24, %s2988_s1 }
 0x7af   :  { %v627_v25 = vpop.permute.xlu1 %626 }
 0x7b0   :  { %629 = vst.msk [vmem:[#allocation3 + $0x18] sm:$0xff] %vm312_vm0, %v627_v25  ;;  %2317 = vmatmul.mubr.msk.f32.vlgmr.msra.gmra.mrb[4].mxu0 %vm209_vm2, %v627_v25 }
 0x7b1   :  { %630 = vst.msk [vmem:[#allocation3 + $0x20] sm:$0xff] %vm314_vm1, %v627_v25  ;;  %2679 = vmatpush1.bf16.msra.mxu0 %v3074_v9  ;;  %909 = vmatprep.mubr.f32.mxu0 %v2985_v3 }
 0x7b2   :  { %2681 = vmatprep.subr.bf16.mxu0 %v3076_v10 }
 0x7b5   :  { %2683 = vmatpush1.bf16.msra.mxu0 %v3093_v15 }
 0x7b6   :  { %2685 = vmatprep.subr.bf16.mxu0 %v3097_v16 }
 0x7b9   :  { %2687 = vmatpush1.bf16.msra.mxu0 %v3119_v22 }
 0x7ba   :  { %2689 = vmatprep.subr.bf16.mxu0 %v3123_v23 }
 0x7bd   :  { %2691 = vmatpush1.bf16.msra.mxu0 %v3134_v27 }
 0x883   :  { %v701_v33 = vpop.f32.mrb[4].mxu0 }
 0x884   :  { %v706_v37 = vadd.f32 %v701_v33, %v153_v32  ;;  %v703_v38 = vpop.f32.mrb[5].mxu0  ;;  %v171_v33 = vmul.f32 %v3209_v13, %v3167_v35 }
 0x885   :  { %v707_v47 = vadd.f32 %v703_v38, %v154_v46  ;;  %v172_v46 = vmul.f32 %v3209_v13, %v3183_v44 }
 0x886   :  { %v2318_v41 = vmul.f32 -1.442695, %v706_v37  ;;  %v169_v37 = vmul.f32 %v3211_v14, %v3164_v34 }
 0x887   :  { %v2319_v55 = vmul.f32 -1.442695, %v707_v47 }
 0x888   :  { %2863 = vpow2.f32 %v2318_v41  ;;  %v173_v38 = vadd.f32 %v171_v33, %v169_v37  ;;  %v1066_v33 = vld [vmem:[%s3605_s3 + $0x38] sm:$0xff]  ;;  %v2995_v37 = vmov 0.0|0.0  }
 0x889   :  { %2865 = vtanh.f32 %v707_v47  ;;  %v170_v47 = vmul.f32 %v3211_v14, %v3181_v43 }
 0x88a   :  { %v175_v39 = vadd.f32 %v173_v38, %v3179_v42  ;;  %v1201_v38 = vld [vmem:[%s3606_s5] sm:$0xff] }
 0x892   :  { %v2864_v49 = vpop.eup %2863 }
 0x893   :  { %v714_v50 = vadd.f32 1.0, %v2864_v49  ;;  %v2866_v51 = vpop.eup %2865 }
 0x895   :  { %2867 = vrcp.f32 %v714_v50  ;;  %v174_v50 = vadd.f32 %v172_v46, %v170_v47  ;;  %v1204_v46 = vld [vmem:[%s3606_s5 + $0x18] sm:$0xff] }
 0x896   :  { %2869 = vpow2.f32 %v2319_v55 }
 0x89f   :  { %v2868_v52 = vpop.eup %2867 }
 0x8a0   :  { %v722_v54 = vmul.f32 %v2868_v52, %v2866_v51  ;;  %v2870_v19 = vpop.eup %2869  ;;  %v721_v48 = vmul.f32 %v2868_v52, %v622_v18  ;;  %v176_v51 = vadd.f32 %v174_v50, %v3190_v53 }
 0x8a1   :  { %v715_v56 = vadd.f32 1.0, %v2870_v19 }
 0x8a2   :  { %724 = vrot.lane.b32.xlu0 %v722_v54, %s2988_s1 }
 0x8a3   :  { %2871 = vrcp.f32 %v715_v56 }
 0x8ad   :  { %v2872_v59 = vpop.eup %2871 }
 0x914   :  { %v725_v57 = vpop.permute.xlu0 %724 }
 0x915   :  { %v727_v58 = vadd.f32 %v725_v57, %v721_v48 }
 0x917   :  { %2873 = vtanh.f32 %v727_v58 }
 0x921   :  { %v2874_v62 = vpop.eup %2873 }
 0x922   :  { %v729_v5 = vmul.f32 %v2874_v62, %v2872_v59 }
 0x924   :  { %731 = vrot.lane.b32.xlu1 %v729_v5, %s2988_s1 }
 0x996   :  { %v732_v63 = vpop.permute.xlu1 %731 }
 0x997   :  { %734 = vst.msk [vmem:[#allocation3 + $0x20] sm:$0xff] %vm312_vm0, %v732_v63  ;;  %2320 = vmatmul.mubr.msk.f32.vlgmr.msra.gmra.mrb[4].mxu1 %vm209_vm2, %v732_v63 }
 0x998   :  { %735 = vst.msk [vmem:[#allocation3 + $0x18] sm:$0xff] %vm314_vm1, %v732_v63  ;;  %2695 = vmatpush1.bf16.msra.mxu1 %v3074_v9  ;;  %1014 = vmatprep.mubr.f32.mxu1 %v2985_v3  ;;  %v160_v9 = vmul.f32 %v3241_v61, %v3167_v35 }
 0x999   :  { %2697 = vmatprep.subr.bf16.mxu1 %v3076_v10 }
 0x99a   :  { %v162_v1 = vadd.f32 %v160_v9, %v158_v0 }
 0x99c   :  { %2699 = vmatpush1.bf16.msra.mxu1 %v3093_v15  ;;  %v164_v2 = vadd.f32 %v162_v1, %v3179_v42  ;;  %v182_v1 = vmul.f32 %v3167_v35, %v3153_v30 }
 0x99d   :  { %2701 = vmatprep.subr.bf16.mxu1 %v3097_v16  ;;  %v159_v16 = vmul.f32 %v3239_v60, %v3181_v43 }
 0x9a0   :  { %2703 = vmatpush1.bf16.msra.mxu1 %v3119_v22  ;;  %v161_v22 = vmul.f32 %v3241_v61, %v3183_v44 }
 0x9a1   :  { %2705 = vmatprep.subr.bf16.mxu1 %v3123_v23 }
 0x9a4   :  { %2707 = vmatpush1.bf16.msra.mxu1 %v3134_v27  ;;  %v163_v27 = vadd.f32 %v161_v22, %v159_v16 }
 0x9a5   :  { %2724 = vmatprep.subr.bf16.mxu1 %v2995_v37 }
 0x9a6   :  { %v165_v6 = vadd.f32 %v163_v27, %v3190_v53 }
 0xa6a   :  { %v806_v10 = vpop.f32.mrb[4].mxu1 }
 0xa6b   :  { %v811_v4 = vadd.f32 %v806_v10, %v164_v2  ;;  %v808_v15 = vpop.f32.mrb[5].mxu1  ;;  %v180_v2 = vmul.f32 %v3169_v36, %v3164_v34  ;;  %v183_v10 = vmul.f32 %v3183_v44, %v3153_v30 }
 0xa6c   :  { %v812_v7 = vadd.f32 %v808_v15, %v165_v6 }
 0xa6d   :  { %v2321_v23 = vmul.f32 -1.442695, %v811_v4  ;;  %v181_v4 = vmul.f32 %v3169_v36, %v3181_v43  ;;  %v184_v15 = vadd.f32 %v182_v1, %v180_v2  ;;  %v1059_v36 = vld [vmem:[%s3605_s3] sm:$0xff]  ;;  %v1061_v43 = vld [vmem:[%s3605_s3 + $0x10] sm:$0xff] }
 0xa6e   :  { %v2322_v20 = vmul.f32 -1.442695, %v812_v7 }
 0xa6f   :  { %2875 = vpow2.f32 %v2321_v23  ;;  %v185_v16 = vadd.f32 %v183_v10, %v181_v4  ;;  %v186_v22 = vadd.f32 %v184_v15, %v3179_v42  ;;  %v1060_v42 = vld [vmem:[%s3605_s3 + $0x8] sm:$0xff] }
 0xa70   :  { %2877 = vtanh.f32 %v812_v7 }
 0xa71   :  { %v187_v27 = vadd.f32 %v185_v16, %v3190_v53  ;;  %v2708_v53 = vpack.c.bf16 %v1060_v42, %v1059_v36 }
 0xa73   :  { %2709 = vmatprep.subr.bf16.mxu0 %v2708_v53 }
 0xa79   :  { %v2876_v8 = vpop.eup %2875 }
 0xa7a   :  { %v819_v11 = vadd.f32 1.0, %v2876_v8  ;;  %v2878_v12 = vpop.eup %2877 }
 0xa7c   :  { %2879 = vrcp.f32 %v819_v11 }
 0xa7d   :  { %2881 = vpow2.f32 %v2322_v20 }
 0xa86   :  { %v2880_v17 = vpop.eup %2879 }
 0xa87   :  { %v827_v18 = vmul.f32 %v2880_v17, %v2878_v12  ;;  %v2882_v60 = vpop.eup %2881  ;;  %v826_v61 = vmul.f32 %v2880_v17, %v727_v58  ;;  %v1062_v17 = vld [vmem:[%s3605_s3 + $0x18] sm:$0xff] }
 0xa88   :  { %v820_v21 = vadd.f32 1.0, %v2882_v60 }
 0xa89   :  { %829 = vrot.lane.b32.xlu0 %v827_v18, %s2988_s1  ;;  %v2712_v18 = vpack.c.bf16 %v1062_v17, %v1061_v43 }
 0xa8a   :  { %2883 = vrcp.f32 %v820_v21 }
 0xa94   :  { %v2884_v26 = vpop.eup %2883 }
 0xafb   :  { %v830_v24 = vpop.permute.xlu0 %829 }
 0xafc   :  { %v832_v25 = vadd.f32 %v830_v24, %v826_v61 }
 0xafe   :  { %2885 = vtanh.f32 %v832_v25 }
 0xb08   :  { %v2886_v28 = vpop.eup %2885 }
 0xb09   :  { %v834_v29 = vmul.f32 %v2886_v28, %v2884_v26  ;;  %v1063_v26 = vld [vmem:[%s3605_s3 + $0x20] sm:$0xff]  ;;  %v1064_v28 = vld [vmem:[%s3605_s3 + $0x28] sm:$0xff] }
 0xb0b   :  { %836 = vrot.lane.b32.xlu1 %v834_v29, %s2988_s1  ;;  %v2716_v29 = vpack.c.bf16 %v1064_v28, %v1063_v26 }
 0xb7d   :  { %v837_v32 = vpop.permute.xlu1 %836 }
 0xb7e   :  { %839 = vst.msk [vmem:[#allocation3 + $0x28] sm:$0xff] %vm312_vm0, %v837_v32  ;;  %2323 = vmatmul.mubr.msk.f32.vlgmr.msra.gmra.mrb[6].mxu0 %vm209_vm2, %v837_v32 }
 0xb7f   :  { %840 = vst.msk [vmem:[#allocation3 + $0x10] sm:$0xff] %vm314_vm1, %v837_v32  ;;  %2711 = vmatpush3.bf16.msra.mxu0 %v2708_v53  ;;  %v1065_v32 = vld [vmem:[%s3605_s3 + $0x30] sm:$0xff] }
 0xb80   :  { %2713 = vmatprep.subr.bf16.mxu0 %v2712_v18 }
 0xb83   :  { %2715 = vmatpush3.bf16.msra.mxu0 %v2712_v18 }
 0xb84   :  { %2717 = vmatprep.subr.bf16.mxu0 %v2716_v29 }
 0xb87   :  { %2719 = vmatpush3.bf16.msra.mxu0 %v2716_v29 }
 0xc51   :  { %v911_v40 = vpop.f32.mrb[6].mxu0 }
 0xc52   :  { %v916_v41 = vadd.f32 %v911_v40, %v175_v39  ;;  %v913_v45 = vpop.f32.mrb[7].mxu0  ;;  %v1202_v39 = vld [vmem:[%s3606_s5 + $0x8] sm:$0xff]  ;;  %v2720_v40 = vpack.c.bf16 %v1066_v33, %v1065_v32 }
 0xc53   :  { %v917_v52 = vadd.f32 %v913_v45, %v176_v51  ;;  %v1203_v45 = vld [vmem:[%s3606_s5 + $0x10] sm:$0xff] }
 0xc54   :  { %v2324_v49 = vmul.f32 -1.442695, %v916_v41  ;;  %v3379_v41 = vpack.c.bf16 %v1202_v39, %v1201_v38  ;;  %2721 = vmatprep.subr.bf16.mxu0 %v2720_v40  ;;  %v3389_v47 = vpack.c.bf16 %v1204_v46, %v1203_v45 }
 0xc55   :  { %v2325_v57 = vmul.f32 -1.442695, %v917_v52  ;;  %2723 = vmatpush3.bf16.msra.mxu0 %v2720_v40 }
 0xc56   :  { %2887 = vpow2.f32 %v2324_v49  ;;  %2742 = vmatprep.subr.bf16.mxu0 %v2995_v37 }
 0xc57   :  { %2889 = vtanh.f32 %v917_v52 }
 0xc60   :  { %v2888_v54 = vpop.eup %2887 }
 0xc61   :  { %v924_v55 = vadd.f32 1.0, %v2888_v54  ;;  %v2890_v19 = vpop.eup %2889 }
 0xc63   :  { %2891 = vrcp.f32 %v924_v55 }
 0xc64   :  { %2893 = vpow2.f32 %v2325_v57  ;;  %v1056_v57 = vld [vmem:[#allocation3 + $0x28] sm:$0xff] }
 0xc6d   :  { %v2892_v56 = vpop.eup %2891 }
 0xc6e   :  { %v932_v48 = vmul.f32 %v2892_v56, %v2890_v19  ;;  %v2894_v13 = vpop.eup %2893  ;;  %v931_v14 = vmul.f32 %v2892_v56, %v832_v25  ;;  %v1053_v19 = vld [vmem:[#allocation3 + $0x10] sm:$0xff]  ;;  %v1054_v56 = vld [vmem:[#allocation3 + $0x18] sm:$0xff] }
 0xc6f   :  { %v925_v58 = vadd.f32 1.0, %v2894_v13 }
 0xc70   :  { %934 = vrot.lane.b32.xlu0 %v932_v48, %s2988_s1  ;;  %v1055_v48 = vld [vmem:[#allocation3 + $0x20] sm:$0xff] }
 0xc71   :  { %2895 = vrcp.f32 %v925_v58 }
 0xc7b   :  { %v2896_v5 = vpop.eup %2895 }
 0xce2   :  { %v935_v59 = vpop.permute.xlu0 %934 }
 0xce3   :  { %v937_v62 = vadd.f32 %v935_v59, %v931_v14 }
 0xce5   :  { %2897 = vtanh.f32 %v937_v62 }
 0xcef   :  { %v2898_v63 = vpop.eup %2897 }
 0xcf0   :  { %v939_v0 = vmul.f32 %v2898_v63, %v2896_v5 }
 0xcf2   :  { %941 = vrot.lane.b32.xlu1 %v939_v0, %s2988_s1 }
 0xd64   :  { %v942_v9 = vpop.permute.xlu1 %941 }
 0xd65   :  { %944 = vst.msk [vmem:[#allocation3 + $0x30] sm:$0xff] %vm312_vm0, %v942_v9  ;;  %2326 = vmatmul.mubr.msk.f32.vlgmr.msra.gmra.mrb[6].mxu1 %vm209_vm2, %v942_v9 }
 0xd66   :  { %945 = vst.msk [vmem:[#allocation3 + $0x8] sm:$0xff] %vm314_vm1, %v942_v9  ;;  %2726 = vmatpush3.bf16.msra.mxu1 %v3379_v41  ;;  %2468 = vmatprep.mubr.msk.f32.mxu1 %vm2996_vm3, %v2985_v3 }
 0xd67   :  { %2727 = vmatprep.subr.bf16.mxu1 %v2995_v37 }
 0xd6a   :  { %2729 = vmatpush3.bf16.msra.mxu1 %v3389_v47 }
 0xd6b   :  { %2730 = vmatprep.subr.bf16.mxu1 %v2995_v37 }
 0xd6c   :  { %v1057_v13 = vld [vmem:[#allocation3 + $0x30] sm:$0xff] }
 0xd6d   :  { %2469 = vmatmul.mubr.f32.vlgmr.msra.gmra.mrb[8].mxu1 %v2985_v3  ;;  %v1052_v55 = vld [vmem:[#allocation3 + $0x8] sm:$0xff] }
 0xd6e   :  { %2732 = vmatpush3.bf16.msra.mxu1 %v3379_v41  ;;  %2479 = vmatprep.mubr.msk.f32.mxu1 %vm2996_vm3, %v2985_v3 }
 0xd6f   :  { %2733 = vmatprep.subr.bf16.mxu1 %v2995_v37 }
 0xd72   :  { %2735 = vmatpush3.bf16.msra.mxu1 %v3389_v47 }
 0xd73   :  { %2736 = vmatprep.subr.bf16.mxu1 %v2995_v37 }
 0xe38   :  { %v1016_v23 = vpop.f32.mrb[6].mxu1 }
 0xe39   :  { %v1021_v6 = vadd.f32 %v1016_v23, %v186_v22  ;;  %v1018_v7 = vpop.f32.mrb[7].mxu1 }
 0xe3a   :  { %v1022_v8 = vadd.f32 %v1018_v7, %v187_v27 }
 0xe3b   :  { %v2327_v35 = vmul.f32 -1.442695, %v1021_v6 }
 0xe3c   :  { %v2328_v20 = vmul.f32 -1.442695, %v1022_v8 }
 0xe3d   :  { %2899 = vpow2.f32 %v2327_v35 }
 0xe3e   :  { %2901 = vtanh.f32 %v1022_v8 }
 0xe40   :  { %v1273_v14 = vpop.f32.mrb[8].mxu1 }
 0xe41   :  { %v2470_v59 = vpop.f32.mrb[9].mxu1 }
 0xe47   :  { %v2900_v11 = vpop.eup %2899 }
 0xe48   :  { %v1029_v34 = vadd.f32 1.0, %v2900_v11  ;;  %v2902_v30 = vpop.eup %2901 }
 0xe4a   :  { %2903 = vrcp.f32 %v1029_v34 }
 0xe4b   :  { %2905 = vpow2.f32 %v2328_v20 }
 0xe54   :  { %v2904_v44 = vpop.eup %2903 }
 0xe55   :  { %v1037_v12 = vmul.f32 %v2904_v44, %v2902_v30  ;;  %v2906_v60 = vpop.eup %2905  ;;  %v1036_v61 = vmul.f32 %v2904_v44, %v937_v62  ;;  %v2329_v62 = vld [vmem:[%s3607_s4] ss:$0 sm:$0xff] }
 0xe56   :  { %v1030_v21 = vadd.f32 1.0, %v2906_v60 }
 0xe57   :  { %1039 = vrot.lane.b32.xlu0 %v1037_v12, %s2988_s1 }
 0xe58   :  { %2907 = vrcp.f32 %v1030_v21 }
 0xe62   :  { %v2908_v49 = vpop.eup %2907 }
 0xec9   :  { %v1040_v24 = vpop.permute.xlu0 %1039 }
 0xeca   :  { %v1042_v25 = vadd.f32 %v1040_v24, %v1036_v61 }
 0xecc   :  { %2909 = vtanh.f32 %v1042_v25 }
 0xed6   :  { %v2910_v50 = vpop.eup %2909 }
 0xed7   :  { %v1044_v51 = vmul.f32 %v2910_v50, %v2908_v49 }
 0xed9   :  { %1046 = vrot.lane.b32.xlu1 %v1044_v51, %s2988_s1 }
 0xf4b   :  { %v1047_v52 = vpop.permute.xlu1 %1046 }
 0xf4c   :  { %1049 = vst.msk [vmem:[#allocation3 + $0x38] sm:$0xff] %vm312_vm0, %v1047_v52 }
 0xf4d   :  { %1050 = vst.msk [vmem:[#allocation3] sm:$0xff] %vm314_vm1, %v1047_v52 }
 0xf53   :  { %v3417_v58 = vld [vmem:[#allocation3 + $0x38] sm:$0xff] }
 0xf54   :  { %v1051_v54 = vld [vmem:[#allocation3] sm:$0xff] }
 0xf55   :  { %2448 = vmatprep.mubr.msk.f32.mxu0 %vm209_vm2, %v1051_v54 }
 0xf56   :  { %2449 = vmatmul.mubr.msk.f32.vlgmr.msra.gmra.mrb[8].mxu0 %vm209_vm2, %v1052_v55 }
 0xf57   :  { %2451 = vmatprep.mubr.msk.f32.mxu0 %vm209_vm2, %v1053_v19  ;;  %2744 = vmatpush3.bf16.msra.mxu0 %v3379_v41 }
 0xf58   :  { %2745 = vmatprep.subr.bf16.mxu0 %v2995_v37 }
 0xf5a   :  { %2452 = vmatmul.mubr.msk.f32.gmra.mrb[10].mxu0 %vm209_vm2, %v1054_v56 }
 0xf5b   :  { %2454 = vmatprep.mubr.msk.f32.mxu0 %vm209_vm2, %v1055_v48  ;;  %2747 = vmatpush3.bf16.msra.mxu0 %v3389_v47 }
 0xf5c   :  { %2754 = vmatprep.subr.bf16.mxu0 %v2995_v37 }
 0xf5e   :  { %2455 = vmatmul.mubr.msk.f32.gmra.mrb[12].mxu0 %vm209_vm2, %v1056_v57 }
 0xf5f   :  { %2457 = vmatprep.mubr.msk.f32.mxu0 %vm209_vm2, %v1057_v13 }
 0xf62   :  { %2458 = vmatmul.mubr.msk.f32.gmra.mrb[14].mxu0 %vm209_vm2, %v3417_v58 }
 0xf63   :  { %2501 = vmatprep.mubr.msk.f32.mxu0 %vm2996_vm3, %v2985_v3 }
0x1029   :  { %v2450_v5 = vpop.f32.mrb[8].mxu0 }
0x102a   :  { %v1168_v63 = vadd.f32 %v2450_v5, %v2329_v62  ;;  %v1162_v0 = vpop.f32.mrb[9].mxu0 }
0x102b   :  { %v1163_v9 = vadd.f32 %v2329_v62, %v1162_v0 }
0x102d   :  { %v1277_v1 = vadd.f32 %v1273_v14, %v1163_v9  ;;  %v2453_v2 = vpop.f32.mrb[10].mxu0 }
0x102e   :  { %v3426_v10 = vadd.f32 %v2453_v2, %v2329_v62  ;;  %v1172_v4 = vpop.f32.mrb[11].mxu0 }
0x102f   :  { %2911 = vtanh.f32 %v1277_v1  ;;  %v3428_v15 = vadd.f32 %v2329_v62, %v1172_v4  ;;  %v2338_v34 = vmul.f32 -1.442695, %v1277_v1 }
0x1031   :  { %v2456_v16 = vpop.f32.mrb[12].mxu0  ;;  %2913 = vpow2.f32 %v2338_v34 }
0x1032   :  { %v3430_v22 = vadd.f32 %v2456_v16, %v2329_v62  ;;  %v1182_v23 = vpop.f32.mrb[13].mxu0 }
0x1033   :  { %v3432_v27 = vadd.f32 %v2329_v62, %v1182_v23 }
0x1035   :  { %v2459_v6 = vpop.f32.mrb[14].mxu0 }
0x1036   :  { %v3434_v7 = vadd.f32 %v2459_v6, %v2329_v62  ;;  %v1192_v8 = vpop.f32.mrb[15].mxu0 }
0x1037   :  { %v3436_v35 = vadd.f32 %v2329_v62, %v1192_v8 }
0x1039   :  { %v2912_v11 = vpop.eup %2911 }
0x103a   :  { %1287 = vrot.lane.b32.xlu0 %v2912_v11, %s2988_s1 }
0x103b   :  { %v2914_v30 = vpop.eup %2913 }
0x103c   :  { %v1281_v44 = vadd.f32 1.0, %v2914_v30 }
0x103e   :  { %2915 = vrcp.f32 %v1281_v44 }
0x1048   :  { %v2916_v12 = vpop.eup %2915 }
0x1049   :  { %v1285_v43 = vmul.f32 0.0, %v2916_v12 }
0x10ac   :  { %v1288_v36 = vpop.permute.xlu0 %1287 }
0x10ad   :  { %v1290_v42 = vmul.f32 %v2916_v12, %v1288_v36 }
0x10af   :  { %1292 = vrot.lane.b32.xlu1 %v1290_v42, %s2997_s28 }
0x1121   :  { %v1293_v53 = vpop.permute.xlu1 %1292 }
0x1122   :  { %v1295_v17 = vadd.f32 %v1293_v53, %v1285_v43 }
0x1124   :  { %2917 = vtanh.f32 %v1295_v17 }
0x112e   :  { %v2918_v18 = vpop.eup %2917 }
0x112f   :  { %1298 = vrot.lane.b32.xlu0 %v2918_v18, %s2988_s1 }
0x11a1   :  { %v1299_v20 = vpop.permute.xlu0 %1298 }
0x11a2   :  { %v1301_v60 = vmul.f32 %v2916_v12, %v1299_v20 }
0x11a4   :  { %1303 = vrot.lane.b32.xlu1 %v1301_v60, %s2997_s28 }
0x1216   :  { %v1304_v21 = vpop.permute.xlu1 %1303 }
0x1217   :  { %2480 = vmatmul.mubr.msk.f32.vlgmr.msra.gmra.mrb[10].mxu1 %vm312_vm0, %v1304_v21 }
0x1218   :  { %2738 = vmatpush3.bf16.msra.mxu1 %v3379_v41  ;;  %2490 = vmatprep.mubr.msk.f32.mxu1 %vm2996_vm3, %v2985_v3 }
0x1219   :  { %2739 = vmatprep.subr.bf16.mxu1 %v2995_v37 }
0x121c   :  { %2741 = vmatpush3.bf16.msra.mxu1 %v3389_v47 }
0x121d   :  { %2748 = vmatprep.subr.bf16.mxu1 %v2995_v37 }
0x12ea   :  { %v1373_v61 = vpop.f32.mrb[10].mxu1 }
0x12eb   :  { %v1377_v24 = vadd.f32 %v1373_v61, %v1168_v63  ;;  %v2481_v25 = vpop.f32.mrb[11].mxu1 }
0x12ed   :  { %2919 = vtanh.f32 %v1377_v24  ;;  %v2340_v28 = vmul.f32 -1.442695, %v1377_v24 }
0x12ef   :  { %2921 = vpow2.f32 %v2340_v28 }
0x12f7   :  { %v2920_v26 = vpop.eup %2919 }
0x12f8   :  { %1387 = vrot.lane.b32.xlu0 %v2920_v26, %s2988_s1 }
0x12f9   :  { %v2922_v29 = vpop.eup %2921 }
0x12fa   :  { %v1381_v32 = vadd.f32 1.0, %v2922_v29 }
0x12fc   :  { %2923 = vrcp.f32 %v1381_v32 }
0x1306   :  { %v2924_v33 = vpop.eup %2923 }
0x1307   :  { %v1385_v40 = vmul.f32 %v2924_v33, %v1295_v17 }
0x136a   :  { %v1388_v38 = vpop.permute.xlu0 %1387 }
0x136b   :  { %v1390_v39 = vmul.f32 %v2924_v33, %v1388_v38 }
0x136d   :  { %1392 = vrot.lane.b32.xlu1 %v1390_v39, %s2997_s28 }
0x13df   :  { %v1393_v45 = vpop.permute.xlu1 %1392 }
0x13e0   :  { %v1395_v46 = vadd.f32 %v1393_v45, %v1385_v40 }
0x13e2   :  { %2925 = vtanh.f32 %v1395_v46 }
0x13ec   :  { %v2926_v49 = vpop.eup %2925 }
0x13ed   :  { %1398 = vrot.lane.b32.xlu0 %v2926_v49, %s2988_s1 }
0x145f   :  { %v1399_v50 = vpop.permute.xlu0 %1398 }
0x1460   :  { %v1401_v51 = vmul.f32 %v2924_v33, %v1399_v50 }
0x1462   :  { %1403 = vrot.lane.b32.xlu1 %v1401_v51, %s2997_s28 }
0x14d4   :  { %v1404_v52 = vpop.permute.xlu1 %1403 }
0x14d5   :  { %2491 = vmatmul.mubr.msk.f32.vlgmr.msra.gmra.mrb[12].mxu1 %vm312_vm0, %v1404_v52 }
0x14d6   :  { %2750 = vmatpush3.bf16.msra.mxu1 %v3379_v41  ;;  %2512 = vmatprep.mubr.msk.f32.mxu1 %vm2996_vm3, %v2985_v3 }
0x14d7   :  { %2751 = vmatprep.subr.bf16.mxu1 %v2995_v37 }
0x14da   :  { %2753 = vmatpush3.bf16.msra.mxu1 %v3389_v47 }
0x14db   :  { %2760 = vmatprep.subr.bf16.mxu1 %v2995_v37 }
0x15a8   :  { %v1473_v54 = vpop.f32.mrb[12].mxu1 }
0x15a9   :  { %v1477_v55 = vadd.f32 %v1473_v54, %v3428_v15  ;;  %v2492_v19 = vpop.f32.mrb[13].mxu1 }
0x15ab   :  { %2927 = vtanh.f32 %v1477_v55  ;;  %v2342_v48 = vmul.f32 -1.442695, %v1477_v55 }
0x15ad   :  { %2929 = vpow2.f32 %v2342_v48 }
0x15b5   :  { %v2928_v56 = vpop.eup %2927 }
0x15b6   :  { %1487 = vrot.lane.b32.xlu0 %v2928_v56, %s2988_s1 }
0x15b7   :  { %v2930_v57 = vpop.eup %2929 }
0x15b8   :  { %v1481_v13 = vadd.f32 1.0, %v2930_v57 }
0x15ba   :  { %2931 = vrcp.f32 %v1481_v13 }
0x15c4   :  { %v2932_v14 = vpop.eup %2931 }
0x15c5   :  { %v1485_v5 = vmul.f32 %v2932_v14, %v1395_v46 }
0x1628   :  { %v1488_v59 = vpop.permute.xlu0 %1487 }
0x1629   :  { %v1490_v62 = vmul.f32 %v2932_v14, %v1488_v59 }
0x162b   :  { %1492 = vrot.lane.b32.xlu1 %v1490_v62, %s2997_s28  ;;  %v2002_v62 = vld [vmem:[%s3605_s3 + $0x40] sm:$0xff] }
0x169d   :  { %v1493_v63 = vpop.permute.xlu1 %1492 }
0x169e   :  { %v1495_v0 = vadd.f32 %v1493_v63, %v1485_v5  ;;  %v2003_v5 = vld [vmem:[%s3605_s3 + $0x48] sm:$0xff] }
0x169f   :  { %v2773_v63 = vpack.c.bf16 %v2003_v5, %v2002_v62 }
0x16a0   :  { %2933 = vtanh.f32 %v1495_v0 }
0x16aa   :  { %v2934_v9 = vpop.eup %2933 }
0x16ab   :  { %1498 = vrot.lane.b32.xlu0 %v2934_v9, %s2988_s1  ;;  %v2005_v9 = vld [vmem:[%s3605_s3 + $0x58] sm:$0xff] }
0x171d   :  { %v1499_v1 = vpop.permute.xlu0 %1498 }
0x171e   :  { %v1501_v2 = vmul.f32 %v2932_v14, %v1499_v1 }
0x1720   :  { %1503 = vrot.lane.b32.xlu1 %v1501_v2, %s2997_s28 }
0x1792   :  { %v1504_v4 = vpop.permute.xlu1 %1503 }
0x1793   :  { %2502 = vmatmul.mubr.msk.f32.vlgmr.msra.gmra.mrb[16].mxu0 %vm312_vm0, %v1504_v4  ;;  %v2006_v4 = vld [vmem:[%s3605_s3 + $0x60] sm:$0xff] }
0x1794   :  { %2756 = vmatpush3.bf16.msra.mxu0 %v3379_v41  ;;  %2523 = vmatprep.mubr.msk.f32.mxu0 %vm2996_vm3, %v2985_v3 }
0x1795   :  { %2757 = vmatprep.subr.bf16.mxu0 %v2995_v37 }
0x1798   :  { %2759 = vmatpush3.bf16.msra.mxu0 %v3389_v47 }
0x1799   :  { %2766 = vmatprep.subr.bf16.mxu0 %v2995_v37 }
0x1866   :  { %v1573_v15 = vpop.f32.mrb[16].mxu0 }
0x1867   :  { %v1577_v16 = vadd.f32 %v1573_v15, %v3426_v10  ;;  %v2503_v23 = vpop.f32.mrb[17].mxu0  ;;  %v2007_v15 = vld [vmem:[%s3605_s3 + $0x68] sm:$0xff] }
0x1868   :  { %v2008_v23 = vld [vmem:[%s3605_s3 + $0x70] sm:$0xff] }
0x1869   :  { %2935 = vtanh.f32 %v1577_v16  ;;  %v2344_v8 = vmul.f32 -1.442695, %v1577_v16  ;;  %v2779_v16 = vpack.c.bf16 %v2007_v15, %v2006_v4  ;;  %v2144_v15 = vld [vmem:[%s3609_s8 + $0x18] sm:$0xff] }
0x186b   :  { %2937 = vpow2.f32 %v2344_v8 }
0x1873   :  { %v2936_v6 = vpop.eup %2935 }
0x1874   :  { %1587 = vrot.lane.b32.xlu0 %v2936_v6, %s2988_s1  ;;  %v2009_v6 = vld [vmem:[%s3605_s3 + $0x78] sm:$0xff] }
0x1875   :  { %v2938_v11 = vpop.eup %2937  ;;  %v2782_v8 = vpack.c.bf16 %v2009_v6, %v2008_v23  ;;  %v2145_v6 = vld [vmem:[%s3609_s8 + $0x20] sm:$0x3f] }
0x1876   :  { %v1581_v34 = vadd.f32 1.0, %v2938_v11 }
0x1878   :  { %2939 = vrcp.f32 %v1581_v34 }
0x1882   :  { %v2940_v30 = vpop.eup %2939 }
0x1883   :  { %v1585_v36 = vmul.f32 %v2940_v30, %v1495_v0  ;;  %v2004_v0 = vld [vmem:[%s3605_s3 + $0x50] sm:$0xff] }
0x1884   :  { %v2776_v2 = vpack.c.bf16 %v2005_v9, %v2004_v0  ;;  %v2141_v9 = vld [vmem:[%s3609_s8] sm:$0xff] }
0x18e6   :  { %v1588_v44 = vpop.permute.xlu0 %1587 }
0x18e7   :  { %v1590_v12 = vmul.f32 %v2940_v30, %v1588_v44 }
0x18e9   :  { %1592 = vrot.lane.b32.xlu1 %v1590_v12, %s2997_s28 }
0x195b   :  { %v1593_v42 = vpop.permute.xlu1 %1592 }
0x195c   :  { %v1595_v43 = vadd.f32 %v1593_v42, %v1585_v36 }
0x195e   :  { %2941 = vtanh.f32 %v1595_v43 }
0x1968   :  { %v2942_v10 = vpop.eup %2941 }
0x1969   :  { %1598 = vrot.lane.b32.xlu0 %v2942_v10, %s2988_s1 }
0x19db   :  { %v1599_v53 = vpop.permute.xlu0 %1598 }
0x19dc   :  { %v1601_v17 = vmul.f32 %v2940_v30, %v1599_v53 }
0x19de   :  { %1603 = vrot.lane.b32.xlu1 %v1601_v17, %s2997_s28 }
0x1a50   :  { %v1604_v18 = vpop.permute.xlu1 %1603 }
0x1a51   :  { %2513 = vmatmul.mubr.msk.f32.vlgmr.msra.gmra.mrb[14].mxu1 %vm312_vm0, %v1604_v18 }
0x1a52   :  { %2762 = vmatpush3.bf16.msra.mxu1 %v3379_v41  ;;  %2534 = vmatprep.mubr.msk.f32.mxu1 %vm2996_vm3, %v2985_v3 }
0x1a53   :  { %2763 = vmatprep.subr.bf16.mxu1 %v2995_v37 }
0x1a56   :  { %2765 = vmatpush3.bf16.msra.mxu1 %v3389_v47 }
0x1a57   :  { %2772 = vmatprep.subr.bf16.mxu1 %v2995_v37 }
0x1b24   :  { %v1673_v20 = vpop.f32.mrb[14].mxu1 }
0x1b25   :  { %v1677_v60 = vadd.f32 %v1673_v20, %v3432_v27  ;;  %v2514_v21 = vpop.f32.mrb[15].mxu1 }
0x1b26   :  { %v2353_v21 = vld [vmem:[%s3607_s4 + $0x1] ss:$0 sm:$0xff] }
0x1b27   :  { %2943 = vtanh.f32 %v1677_v60  ;;  %v2346_v24 = vmul.f32 -1.442695, %v1677_v60 }
0x1b29   :  { %2945 = vpow2.f32 %v2346_v24 }
0x1b31   :  { %v2944_v61 = vpop.eup %2943 }
0x1b32   :  { %1687 = vrot.lane.b32.xlu0 %v2944_v61, %s2988_s1 }
0x1b33   :  { %v2946_v25 = vpop.eup %2945 }
0x1b34   :  { %v1681_v26 = vadd.f32 1.0, %v2946_v25 }
0x1b36   :  { %2947 = vrcp.f32 %v1681_v26 }
0x1b40   :  { %v2948_v28 = vpop.eup %2947 }
0x1b41   :  { %v1685_v33 = vmul.f32 %v2948_v28, %v1595_v43 }
0x1ba4   :  { %v1688_v29 = vpop.permute.xlu0 %1687 }
0x1ba5   :  { %v1690_v32 = vmul.f32 %v2948_v28, %v1688_v29 }
0x1ba7   :  { %1692 = vrot.lane.b32.xlu1 %v1690_v32, %s2997_s28 }
0x1c19   :  { %v1693_v38 = vpop.permute.xlu1 %1692 }
0x1c1a   :  { %v1695_v39 = vadd.f32 %v1693_v38, %v1685_v33 }
0x1c1c   :  { %2949 = vtanh.f32 %v1695_v39 }
0x1c26   :  { %v2950_v27 = vpop.eup %2949 }
0x1c27   :  { %1698 = vrot.lane.b32.xlu0 %v2950_v27, %s2988_s1 }
0x1c99   :  { %v1699_v40 = vpop.permute.xlu0 %1698 }
0x1c9a   :  { %v1701_v45 = vmul.f32 %v2948_v28, %v1699_v40 }
0x1c9c   :  { %1703 = vrot.lane.b32.xlu1 %v1701_v45, %s2997_s28 }
0x1d0e   :  { %v1704_v46 = vpop.permute.xlu1 %1703 }
0x1d0f   :  { %2524 = vmatmul.mubr.msk.f32.vlgmr.msra.gmra.mrb[18].mxu0 %vm312_vm0, %v1704_v46 }
0x1d10   :  { %2768 = vmatpush3.bf16.msra.mxu0 %v3379_v41  ;;  %2545 = vmatprep.mubr.msk.f32.mxu0 %vm2996_vm3, %v2985_v3 }
0x1d11   :  { %2769 = vmatprep.subr.bf16.mxu0 %v2995_v37 }
0x1d14   :  { %2771 = vmatpush3.bf16.msra.mxu0 %v3389_v47 }
0x1d15   :  { %2784 = vmatprep.subr.bf16.mxu0 %v2995_v37 }
0x1de2   :  { %v1773_v49 = vpop.f32.mrb[18].mxu0 }
0x1de3   :  { %v1777_v50 = vadd.f32 %v1773_v49, %v3430_v22  ;;  %v2525_v51 = vpop.f32.mrb[19].mxu0 }
0x1de5   :  { %2951 = vtanh.f32 %v1777_v50  ;;  %v2348_v54 = vmul.f32 -1.442695, %v1777_v50  ;;  %v3550_v50 = vld [vmem:[%s3608_s6] ss:$0 sm:$0xff] }
0x1de7   :  { %2953 = vpow2.f32 %v2348_v54 }
0x1def   :  { %v2952_v52 = vpop.eup %2951 }
0x1df0   :  { %1787 = vrot.lane.b32.xlu0 %v2952_v52, %s2988_s1 }
0x1df1   :  { %v2954_v41 = vpop.eup %2953 }
0x1df2   :  { %v1781_v55 = vadd.f32 1.0, %v2954_v41 }
0x1df4   :  { %2955 = vrcp.f32 %v1781_v55 }
0x1dfe   :  { %v2956_v19 = vpop.eup %2955 }
0x1dff   :  { %v1785_v47 = vmul.f32 %v2956_v19, %v1695_v39 }
0x1e62   :  { %v1788_v56 = vpop.permute.xlu0 %1787 }
0x1e63   :  { %v1790_v48 = vmul.f32 %v2956_v19, %v1788_v56 }
0x1e65   :  { %1792 = vrot.lane.b32.xlu1 %v1790_v48, %s2997_s28 }
0x1ed7   :  { %v1793_v57 = vpop.permute.xlu1 %1792 }
0x1ed8   :  { %v1795_v13 = vadd.f32 %v1793_v57, %v1785_v47 }
0x1eda   :  { %2957 = vtanh.f32 %v1795_v13 }
0x1ee4   :  { %v2958_v22 = vpop.eup %2957 }
0x1ee5   :  { %1798 = vrot.lane.b32.xlu0 %v2958_v22, %s2988_s1 }
0x1f57   :  { %v1799_v14 = vpop.permute.xlu0 %1798 }
0x1f58   :  { %v1801_v59 = vmul.f32 %v2956_v19, %v1799_v14 }
0x1f5a   :  { %1803 = vrot.lane.b32.xlu1 %v1801_v59, %s2997_s28 }
0x1fcc   :  { %v1804_v1 = vpop.permute.xlu1 %1803 }
0x1fcd   :  { %2535 = vmatmul.mubr.msk.f32.vlgmr.msra.gmra.mrb[16].mxu1 %vm312_vm0, %v1804_v1  ;;  %v2142_v1 = vld [vmem:[%s3609_s8 + $0x8] sm:$0xff] }
0x1fce   :  { %2774 = vmatpush3.bf16.msra.mxu1 %v2773_v63  ;;  %2564 = vmatprep.mubr.msk.f32.mxu1 %vm2996_vm3, %v2985_v3  ;;  %v2785_v4 = vpack.c.bf16 %v2142_v1, %v2141_v9 }
0x1fcf   :  { %2775 = vmatprep.subr.bf16.mxu1 %v2995_v37 }
0x1fd2   :  { %2777 = vmatpush3.bf16.msra.mxu1 %v2776_v2  ;;  %v2143_v2 = vld [vmem:[%s3609_s8 + $0x10] sm:$0xff] }
0x1fd3   :  { %2778 = vmatprep.subr.bf16.mxu1 %v2995_v37 }
0x1fd6   :  { %2780 = vmatpush3.bf16.msra.mxu1 %v2779_v16  ;;  %v2788_v16 = vpack.c.bf16 %v2144_v15, %v2143_v2 }
0x1fd7   :  { %2781 = vmatprep.subr.bf16.mxu1 %v2995_v37 }
0x1fda   :  { %2783 = vmatpush3.bf16.msra.mxu1 %v2782_v8  ;;  %v2149_v8 = vld [vmem:[%s3610_s7] sm:$0x3]  ;;  %s3000_s7 = smov 127  }
0x1fdd   :  { %2565 = vmatmul.mubr.msk.f32.vlgmr.msra.gmra.mrb[18].mxu1 %vm209_vm2, %v3417_v58 }
0x20a0   :  { %v1873_v11 = vpop.f32.mrb[16].mxu1 }
0x20a1   :  { %v1877_v34 = vadd.f32 %v1873_v11, %v3436_v35  ;;  %v2536_v30 = vpop.f32.mrb[17].mxu1 }
0x20a3   :  { %2959 = vtanh.f32 %v1877_v34  ;;  %v2350_v42 = vmul.f32 -1.442695, %v1877_v34 }
0x20a5   :  { %2961 = vpow2.f32 %v2350_v42 }
0x20ad   :  { %v2960_v44 = vpop.eup %2959 }
0x20ae   :  { %1887 = vrot.lane.b32.xlu0 %v2960_v44, %s2988_s1 }
0x20af   :  { %v2962_v43 = vpop.eup %2961 }
0x20b0   :  { %v2081_v12 = vpop.f32.mrb[18].mxu1  ;;  %v1881_v10 = vadd.f32 1.0, %v2962_v43 }
0x20b1   :  { %v2566_v36 = vpop.f32.mrb[19].mxu1  ;;  %v2082_v61 = vadd.f32 %v2353_v21, %v2081_v12 }
0x20b2   :  { %2963 = vrcp.f32 %v1881_v10 }
0x20b3   :  { %v2355_v28 = vmul.f32 -1.442695, %v2082_v61 }
0x20bc   :  { %v2964_v53 = vpop.eup %2963 }
0x20bd   :  { %v1885_v58 = vmul.f32 %v2964_v53, %v1795_v13 }
0x2120   :  { %v1888_v17 = vpop.permute.xlu0 %1887 }
0x2121   :  { %v1890_v18 = vmul.f32 %v2964_v53, %v1888_v17 }
0x2123   :  { %1892 = vrot.lane.b32.xlu1 %v1890_v18, %s2997_s28 }
0x2195   :  { %v1893_v20 = vpop.permute.xlu1 %1892 }
0x2196   :  { %v1895_v35 = vadd.f32 %v1893_v20, %v1885_v58  ;;  %v2360_v58 = vld [vmem:[%s3609_s8 + $0x27] ss:$0 sm:$0xff] }
0x2198   :  { %2965 = vtanh.f32 %v1895_v35 }
0x2199   :  { %2967 = vtanh.f32 %v2082_v61 }
0x219a   :  { %2969 = vpow2.f32 %v2355_v28 }
0x21a2   :  { %v2966_v60 = vpop.eup %2965 }
0x21a3   :  { %1898 = vrot.lane.b32.xlu0 %v2966_v60, %s2988_s1  ;;  %v2968_v26 = vpop.eup %2967 }
0x21a4   :  { %v2970_v29 = vpop.eup %2969 }
0x21a5   :  { %v2088_v32 = vadd.f32 1.0, %v2970_v29 }
0x21a7   :  { %2971 = vrcp.f32 %v2088_v32 }
0x21b1   :  { %v2972_v38 = vpop.eup %2971 }
0x21b2   :  { %v2092_v40 = vmul.f32 0.0, %v2972_v38 }
0x2215   :  { %v1899_v24 = vpop.permute.xlu0 %1898 }
0x2216   :  { %v1901_v25 = vmul.f32 %v2964_v53, %v1899_v24  ;;  %v2357_v53 = vld [vmem:[%s3609_s8 + $0x26] ss:$0 sm:$0xff] }
0x2218   :  { %1903 = vrot.lane.b32.xlu1 %v1901_v25, %s2997_s28 }
0x221c   :  { %2094 = vrot.lane.b32.xlu1 %v2968_v26, %s2988_s1 }
0x228a   :  { %v1904_v33 = vpop.permute.xlu1 %1903 }
0x228b   :  { %2546 = vmatmul.mubr.msk.f32.vlgmr.msra.gmra.mrb[20].mxu0 %vm312_vm0, %v1904_v33 }
0x228c   :  { %2577 = vmatprep.mubr.msk.f32.mxu0 %vm2996_vm3, %v2985_v3  ;;  %2786 = vmatpush3.bf16.msra.mxu0 %v2785_v4 }
0x228d   :  { %2787 = vmatprep.subr.bf16.mxu0 %v2995_v37  ;;  %v2148_v37 = vld [vmem:[%s3609_s8 + $0x28] sm:$0x1] }
0x228e   :  { %v2095_v39 = vpop.permute.xlu1 %2094  ;;  %v2282_v43 = vrot.slane %v2148_v37, 5  ;;  %v2277_v10 = vrot.slane %v2148_v37, 7 }
0x228f   :  { %v2097_v27 = vmul.f32 %v2972_v38, %v2095_v39 }
0x2290   :  { %2789 = vmatpush3.bf16.msra.mxu0 %v2788_v16 }
0x2291   :  { %2099 = vrot.lane.b32.xlu1 %v2097_v27, %s2997_s28  ;;  %2575 = vmatprep.subr.mxu0 %v2985_v3 }
0x2294   :  { %2576 = vmatpush3.msk.msra.mxu0 %vm2158_vm4, %v2145_v6 }
0x2295   :  { %2578 = vmatmul.mubr.msk.f32.vlgmr.msra.gmra.mrb[22].mxu0 %vm2154_vm5, %v2149_v8 }
0x2303   :  { %v2100_v45 = vpop.permute.xlu1 %2099 }
0x2304   :  { %v2102_v46 = vadd.f32 %v2100_v45, %v2092_v40 }
0x2306   :  { %2973 = vtanh.f32 %v2102_v46 }
0x2310   :  { %v2974_v49 = vpop.eup %2973 }
0x2311   :  { %2105 = vrot.lane.b32.xlu1 %v2974_v49, %s2988_s1  ;;  %v2245_v49 = vrot.slane %v2148_v37, %v3155_v31 }
0x2315   :  { %2126 = vrot.lane.b32.xlu1 %v3550_v50, %s2988_s1 }
0x235e   :  { %v1973_v51 = vpop.f32.mrb[20].mxu0 }
0x235f   :  { %v1977_v52 = vadd.f32 %v1973_v51, %v3434_v7  ;;  %v2547_v54 = vpop.f32.mrb[21].mxu0 }
0x2361   :  { %2975 = vtanh.f32 %v1977_v52  ;;  %v2352_v47 = vmul.f32 -1.442695, %v1977_v52 }
0x2363   :  { %2977 = vpow2.f32 %v2352_v47 }
0x2368   :  { %v2228_v44 = vpop.f32.mrb[22].mxu0 }
0x2369   :  { %v2579_v12 = vpop.f32.mrb[23].mxu0  ;;  %v2229_v17 = vadd.f32 %v2357_v53, %v2228_v44 }
0x236b   :  { %v2976_v41 = vpop.eup %2975  ;;  %v2232_v18 = vmax.f32 %v2229_v17, 0.0 }
0x236c   :  { %1987 = vrot.lane.b32.xlu0 %v2976_v41, %s2988_s1 }
0x236d   :  { %v2978_v57 = vpop.eup %2977  ;;  %v2237_v20 = vmul.f32 %v2360_v58, %v2232_v18 }
0x236e   :  { %v1981_v13 = vadd.f32 1.0, %v2978_v57 }
0x2370   :  { %2979 = vrcp.f32 %v1981_v13 }
0x237a   :  { %v2980_v22 = vpop.eup %2979 }
0x237b   :  { %v1985_v5 = vmul.f32 %v2980_v22, %v1895_v35  ;;  %v2239_v35 = vsel %vm2238_vm6, %v2237_v20, 0.0 }
0x2383   :  { %v2106_v55 = vpop.permute.xlu1 %2105 }
0x2384   :  { %v2108_v19 = vmul.f32 %v2972_v38, %v2106_v55 }
0x2387   :  { %v2127_v56 = vpop.permute.xlu1 %2126 }
0x2388   :  { %v2129_v48 = vmul.f32 %v2127_v56, %v2108_v19 }
0x238a   :  { %2131 = vrot.lane.b32.xlu1 %v2129_v48, %s2997_s28 }
0x23de   :  { %v1988_v14 = vpop.permute.xlu0 %1987 }
0x23df   :  { %v1990_v59 = vmul.f32 %v2980_v22, %v1988_v14 }
0x23e1   :  { %1992 = vrot.lane.b32.xlu0 %v1990_v59, %s2997_s28 }
0x23fc   :  { %v2132_v7 = vpop.permute.xlu1 %2131 }
0x23fd   :  { %v2134_v62 = vsel %vm312_vm0, %v2132_v7, 0.0 }
0x23fe   :  { %2135 = vadd.xlane.f32.xlu1 %v2134_v62 }
0x240f   :  { %2261 = vrot.lane.b32.xlu1 %v2148_v37, %s2999_s17 }
0x2413   :  { %2257 = vrot.lane.b32.xlu1 %v2148_v37, %s3000_s7 }
0x2417   :  { %2278 = vrot.lane.b32.xlu1 %v2277_v10, %s3000_s7 }
0x241b   :  { %2270 = vrot.lane.b32.xlu1 %v2148_v37, %s3001_s0 }
0x2453   :  { %v1993_v63 = vpop.permute.xlu0 %1992 }
0x2454   :  { %v1995_v0 = vadd.f32 %v1993_v63, %v1985_v5 }
0x2456   :  { %2981 = vtanh.f32 %v1995_v0 }
0x2460   :  { %v2982_v23 = vpop.eup %2981 }
0x2461   :  { %1998 = vrot.lane.b32.xlu0 %v2982_v23, %s2988_s1 }
0x2465   :  { %2115 = vrot.lane.b32.xlu0 %v3550_v50, %s2998_s14 }
0x248b   :  { %v2136_v60 = vpop.xlane.xlu1 %2135 }
0x248f   :  { %v2262_v33 = vpop.permute.xlu1 %2261 }
0x2493   :  { %v2258_v46 = vpop.permute.xlu1 %2257 }
0x2497   :  { %v2279_v51 = vpop.permute.xlu1 %2278 }
0x249b   :  { %v2271_v54 = vpop.permute.xlu1 %2270 }
0x24d3   :  { %v1999_v3 = vpop.permute.xlu0 %1998 }
0x24d4   :  { %v2001_v11 = vmul.f32 %v2980_v22, %v1999_v3 }
0x24d7   :  { %v2116_v34 = vpop.permute.xlu0 %2115 }
0x24d8   :  { %v2118_v30 = vmul.f32 %v2116_v34, %v2001_v11 }
0x24da   :  { %2120 = vrot.lane.b32.xlu0 %v2118_v30, %s2997_s28 }
0x254c   :  { %v2121_v36 = vpop.permute.xlu0 %2120 }
0x254d   :  { %v2123_v42 = vsel %vm312_vm0, %v2121_v36, 0.0 }
0x254e   :  { %2124 = vadd.xlane.f32.xlu0 %v2123_v42 }
0x2564   :  { %2283 = vrot.lane.b32.xlu0 %v2282_v43, %s2999_s17 }
0x2583   :  { %2240 = vadd.xlane.f32.xlu0 %v2239_v35 }
0x25db   :  { %v2125_v21 = vpop.xlane.xlu0 %2124 }
0x25dc   :  { %v2137_v61 = vadd.f32 %v2136_v60, %v2125_v21 }
0x25de   :  { %v2139_v24 = vadd.f32 %v3550_v50, %v2137_v61 }
0x25df   :  { %v2284_v38 = vpop.permute.xlu0 %2283 }
0x25e0   :  { %2983 = vtanh.f32 %v2139_v24 }
0x25ea   :  { %v2984_v25 = vpop.eup %2983 }
0x25eb   :  { %v2249_v26 = vrot.slane %v2984_v25, 1  ;;  %v2252_v29 = vrot.slane %v2984_v25, 2 }
0x25ed   :  { %v2251_v28 = vadd.f32 %v2984_v25, %v2249_v26 }
0x25ef   :  { %v2254_v32 = vadd.f32 %v2252_v29, %v2251_v28 }
0x25f1   :  { %v2255_v39 = vmul.f32 0.33333334, %v2254_v32 }
0x25f3   :  { %v2264_v27 = vmul.f32 %v2262_v33, %v2255_v39  ;;  %v2286_v40 = vmul.f32 %v2284_v38, %v2255_v39 }
0x25f5   :  { %2266 = vrot.lane.b32.xlu1 %v2264_v27, %s2988_s1  ;;  %v2288_v45 = vrot.slane %v2286_v40, 2 }
0x25f9   :  { %2289 = vrot.lane.b32.xlu1 %v2288_v45, %s2988_s1 }
0x25fd   :  { %2293 = vrot.lane.b32.xlu1 %v2277_v10, %s3001_s0 }
0x2610   :  { %v2241_v50 = vpop.xlane.xlu0 %2240 }
0x2611   :  { %v2246_v52 = vadd.f32 %v2245_v49, %v2241_v50 }
0x2613   :  { %v2247_v41 = vmax.f32 %v2246_v52, 0.0 }
0x2615   :  { %v2260_v55 = vmul.f32 %v2258_v46, %v2247_v41  ;;  %v2281_v57 = vmul.f32 %v2279_v51, %v2247_v41 }
0x2667   :  { %v2267_v19 = vpop.permute.xlu1 %2266 }
0x2668   :  { %v2269_v56 = vadd.f32 %v2267_v19, %v2260_v55 }
0x266a   :  { %v2273_v48 = vadd.f32 %v2271_v54, %v2269_v56 }
0x266b   :  { %v2290_v47 = vpop.permute.xlu1 %2289 }
0x266c   :  { %v2274_v13 = vmax.f32 %v2273_v48, 0.0  ;;  %v2292_v22 = vadd.f32 %v2290_v47, %v2281_v57 }
0x266e   :  { %2276 = vst.msk [vmem:[%s3611_s9] sm:$0x1] %vm2275_vm7, %v2274_v13 }
0x266f   :  { %v2294_v14 = vpop.permute.xlu1 %2293 }
0x2670   :  { %v2296_v31 = vadd.f32 %v2294_v14, %v2292_v22 }
0x2672   :  { %v2297_v59 = vmax.f32 %v2296_v31, 0.0 }
0x2674   :  { %2299 = vst.msk [vmem:[%s3611_s9] sm:$0x2] %vm2298_vm8, %v2297_v59 }

</bundles_post_ra>
